<compile_context>
chip_gen: v7x
topology: tpu7x:2x2x1
jax: 0.10.0
libtpu: 0.0.40
codegen_flags: <defaults>
</compile_context>

<pallas_src>
import functools

import jax
import jax.numpy as jnp
from jax.experimental import pallas as pl
from jax.experimental.pallas import tpu as pltpu

# ----------------------------- model hyper-params (small) -----------------------------
NTOKEN = 50
NINP = 32
NHID = 32
NLAYERS = 2          # kernel is specialized to the 2-layer interleaved schedule
HID_OUTPUT = 100
SEQ = 8
BATCH = 4

HID_PAD = ((HID_OUTPUT + 127) // 128) * 128   # 128 : lane-dense decoder1 output
NTOK_PAD = ((NTOKEN + 127) // 128) * 128      # 128 : lane-dense decoder2 (final) output / one-hot width


# ----------------------------- fused forward Pallas kernel ----------------------------
def _fused_forward_kernel(seq, bp,
                          tok_ref, emb_tbl_ref,
                          wih1_ref, whh1_ref, b1_ref,
                          w2_ref, b2_ref,
                          h0_ref, c0_ref,
                          d1w_ref, d1b_ref, d2w_ref, d2b_ref,
                          dec_ref, hcN_ref,
                          gx_sc):
    """Whole forward pass in one kernel invocation (no grid).

    inputs : tok(S*BP,1) i32, emb_tbl(NTOK_PAD,NINP),
             wih1_t(NINP,4H), whh1_t(H,4H), b1(1,4H),
             w2_cat(2H,4H) = vstack(Wih2^T, Whh2^T), b2(1,4H),
             h0(2,BP,H), c0(2,BP,H),
             d1w(H,HID_PAD), d1b(1,HID_PAD), d2w(HID_PAD,NTOK_PAD), d2b(1,NTOK_PAD)
    outputs: dec(S*BP, NTOK_PAD), hcN(BP, 4H) = [h1|c1|h2|c2]
    scratch: gx_sc(S*BP, 4H)  -- layer-1 input projection for all timesteps
    """
    H = NHID

    # ---- embedding gather, in-kernel, as a one-hot matmul on the MXU ----
    tok = tok_ref[...]                                                     # (S*BP, 1) i32
    onehot = (jax.lax.broadcasted_iota(jnp.int32, (seq * bp, NTOK_PAD), 1)
              == tok).astype(jnp.float32)                                  # (S*BP, 128)
    emb = jnp.dot(onehot, emb_tbl_ref[...],
                  preferred_element_type=jnp.float32)                      # (S*BP, NINP)

    # ---- layer-1 input projection for every timestep at once (bias hoisted) ----
    gx_sc[...] = (jnp.dot(emb, wih1_ref[...], preferred_element_type=jnp.float32)
                  + b1_ref[...])                                           # (S*BP, 4H)

    h1 = h0_ref[0]; c1 = c0_ref[0]                                         # (BP, H)
    h2 = h0_ref[1]; c2 = c0_ref[1]

    def lstm_cell(gates, c_prev):
        # Two full-(8,128)-vreg transcendental passes cover all four gates (i,f,o via
        # sigmoid; g via tanh) -> 3 EUP pushes per cell step incl. tanh(c_new).
        sig = jax.nn.sigmoid(gates)
        tnh = jnp.tanh(gates)
        i_g = sig[:, 0 * H:1 * H]
        f_g = sig[:, 1 * H:2 * H]
        g_g = tnh[:, 2 * H:3 * H]
        o_g = sig[:, 3 * H:4 * H]
        c_new = f_g * c_prev + i_g * g_g
        h_new = o_g * jnp.tanh(c_new)
        return h_new, c_new

    for t in range(seq):                       # statically unrolled, layers interleaved
        # ---- layer 1, step t ----
        g1 = gx_sc[t * bp:(t + 1) * bp, :] + jnp.dot(
            h1, whh1_ref[...], preferred_element_type=jnp.float32)         # (BP, 4H)
        h1, c1 = lstm_cell(g1, c1)
        # ---- layer 2, step t : single MXU push on stacked [y1_t | h2] ----
        lhs2 = jnp.concatenate([h1, h2], axis=1)                           # (BP, 2H)
        g2 = jnp.dot(lhs2, w2_ref[...], preferred_element_type=jnp.float32) + b2_ref[...]
        h2, c2 = lstm_cell(g2, c2)
        # ---- decoders per step: off the recurrence critical path, lane-dense store ----
        hid = jnp.dot(h2, d1w_ref[...], preferred_element_type=jnp.float32) + d1b_ref[...]
        dec = jnp.dot(hid, d2w_ref[...], preferred_element_type=jnp.float32) + d2b_ref[...]
        dec_ref[t * bp:(t + 1) * bp, :] = dec.astype(dec_ref.dtype)        # (8,128) aligned

    # final states packed into ONE lane-dense (BP, 4H) = (8, 128) store
    hcN_ref[...] = jnp.concatenate([h1, c1, h2, c2], axis=1)
    # TODO(synk): lm_out = softmax(decoded) and the debug entropy branch are dead code on
    # the returned (parsing=False) path, so they are omitted.


# ----------------------------- parameter init (deterministic, PyTorch-like) ------------
def init_params(key):
    initrange = 0.1
    stdv = 1.0 / jnp.sqrt(jnp.float32(NHID))          # PyTorch nn.LSTM default init range
    keys = jax.random.split(key, 3 + 4 * NLAYERS)
    params = {}
    params["emb"] = jax.random.uniform(keys[0], (NTOKEN, NINP), jnp.float32,
                                       -initrange, initrange)
    params["dec1_w"] = jax.random.uniform(keys[1], (HID_OUTPUT, NHID), jnp.float32,
                                          -initrange, initrange)
    params["dec1_b"] = jnp.zeros((HID_OUTPUT,), jnp.float32)
    params["dec2_w"] = jax.random.uniform(keys[2], (NTOKEN, HID_OUTPUT), jnp.float32,
                                          -initrange, initrange)
    params["dec2_b"] = jnp.zeros((NTOKEN,), jnp.float32)
    lstm = []
    for l in range(NLAYERS):
        in_dim = NINP if l == 0 else NHID
        k = keys[3 + 4 * l: 3 + 4 * (l + 1)]
        w_ih = jax.random.uniform(k[0], (4 * NHID, in_dim), jnp.float32, -stdv, stdv)
        w_hh = jax.random.uniform(k[1], (4 * NHID, NHID), jnp.float32, -stdv, stdv)
        b_ih = jax.random.uniform(k[2], (4 * NHID,), jnp.float32, -stdv, stdv)
        b_hh = jax.random.uniform(k[3], (4 * NHID,), jnp.float32, -stdv, stdv)
        lstm.append((w_ih, w_hh, b_ih, b_hh))
    params["lstm"] = lstm
    return params


def pack_params(params):
    """Pre-transpose / pre-pad / pre-stack weights once (no per-call transpose HLOs)."""
    assert NLAYERS == 2, "fused kernel is specialized to the 2-layer interleaved schedule"
    packed = {}
    # embedding table zero-padded to 128 rows so the in-kernel one-hot width is lane-dense
    packed["emb_pad"] = jnp.zeros((NTOK_PAD, NINP), jnp.float32).at[:NTOKEN, :].set(
        params["emb"])
    w_ih1, w_hh1, b_ih1, b_hh1 = params["lstm"][0]
    w_ih2, w_hh2, b_ih2, b_hh2 = params["lstm"][1]
    packed["wih1_t"] = jnp.transpose(w_ih1)                              # (NINP, 4H)
    packed["whh1_t"] = jnp.transpose(w_hh1)                              # (H, 4H)
    packed["b1"] = (b_ih1 + b_hh1).reshape(1, 4 * NHID)
    packed["w2_cat"] = jnp.concatenate(
        [jnp.transpose(w_ih2), jnp.transpose(w_hh2)], axis=0)            # (2H, 4H)
    packed["b2"] = (b_ih2 + b_hh2).reshape(1, 4 * NHID)
    packed["d1w"] = jnp.zeros((NHID, HID_PAD), jnp.float32).at[:, :HID_OUTPUT].set(
        jnp.transpose(params["dec1_w"]))
    packed["d1b"] = jnp.zeros((1, HID_PAD), jnp.float32).at[0, :HID_OUTPUT].set(
        params["dec1_b"])
    packed["d2w"] = jnp.zeros((HID_PAD, NTOK_PAD), jnp.float32).at[:HID_OUTPUT, :NTOKEN].set(
        jnp.transpose(params["dec2_w"]))
    packed["d2b"] = jnp.zeros((1, NTOK_PAD), jnp.float32).at[0, :NTOKEN].set(
        params["dec2_b"])
    return packed


# ----------------------------- forward pass --------------------------------------------
@jax.jit
def forward(packed, tokens, h0, c0):
    S, B = tokens.shape
    BP = ((B + 7) // 8) * 8                 # pad batch to fill f32 sublanes (aligned slices)

    # Only boundary glue left: tiny int32 token pad/reshape + zero-pad of the initial state.
    tok_col = jnp.pad(tokens, ((0, 0), (0, BP - B))).reshape(S * BP, 1).astype(jnp.int32)
    h0_p = jnp.pad(h0, ((0, 0), (0, BP - B), (0, 0)))                    # (2, BP, H)
    c0_p = jnp.pad(c0, ((0, 0), (0, BP - B), (0, 0)))

    args = [tok_col, packed["emb_pad"],
            packed["wih1_t"], packed["whh1_t"], packed["b1"],
            packed["w2_cat"], packed["b2"],
            h0_p, c0_p,
            packed["d1w"], packed["d1b"], packed["d2w"], packed["d2b"]]

    dec_pad, hcN = pl.pallas_call(
        functools.partial(_fused_forward_kernel, S, BP),
        out_shape=(jax.ShapeDtypeStruct((S * BP, NTOK_PAD), jnp.float32),
                   jax.ShapeDtypeStruct((BP, 2 * NLAYERS * NHID), jnp.float32)),
        in_specs=[pl.BlockSpec(memory_space=pltpu.MemorySpace.VMEM)] * len(args),
        out_specs=(pl.BlockSpec(memory_space=pltpu.MemorySpace.VMEM),) * 2,
        scratch_shapes=[pltpu.VMEM((S * BP, 4 * NHID), jnp.float32)],
    )(*args)

    # strip padding / unpack lane-packed final states (tiny ops)
    decoded = dec_pad.reshape(S, BP, NTOK_PAD)[:, :B, :NTOKEN]
    hN = jnp.stack([hcN[:B, 0 * NHID:1 * NHID], hcN[:B, 2 * NHID:3 * NHID]], axis=0)
    cN = jnp.stack([hcN[:B, 1 * NHID:2 * NHID], hcN[:B, 3 * NHID:4 * NHID]], axis=0)
    return decoded, (hN, cN)


# ----------------------------- pure-JAX reference ---------------------------------------
def reference_forward(params, tokens, h0, c0):
    emb = params["emb"][tokens]
    x = emb
    hs, cs = [], []
    for l in range(NLAYERS):
        w_ih, w_hh, b_ih, b_hh = params["lstm"][l]
        S = x.shape[0]
        h, c = h0[l], c0[l]
        ys = []
        for t in range(S):
            gates = x[t] @ w_ih.T + b_ih + h @ w_hh.T + b_hh
            i_g = jax.nn.sigmoid(gates[:, :NHID])
            f_g = jax.nn.sigmoid(gates[:, NHID:2 * NHID])
            g_g = jnp.tanh(gates[:, 2 * NHID:3 * NHID])
            o_g = jax.nn.sigmoid(gates[:, 3 * NHID:])
            c = f_g * c + i_g * g_g
            h = o_g * jnp.tanh(c)
            ys.append(h)
        x = jnp.stack(ys, axis=0)
        hs.append(h)
        cs.append(c)
    hid = x @ params["dec1_w"].T + params["dec1_b"]
    dec = hid @ params["dec2_w"].T + params["dec2_b"]
    return dec, (jnp.stack(hs), jnp.stack(cs))


# ----------------------------- main ------------------------------------------------------
if __name__ == "__main__":
    key = jax.random.PRNGKey(0)
    k_param, k_tok = jax.random.split(key)
    params = init_params(k_param)
    packed = pack_params(params)

    tokens = jax.random.randint(k_tok, (SEQ, BATCH), 0, NTOKEN, dtype=jnp.int32)
    h0 = jnp.zeros((NLAYERS, BATCH, NHID), jnp.float32)   # init_hidden for LSTM
    c0 = jnp.zeros((NLAYERS, BATCH, NHID), jnp.float32)

    decoded, (hN, cN) = forward(packed, tokens, h0, c0)
    jax.block_until_ready((decoded, hN, cN))

    ref_dec, (ref_h, ref_c) = reference_forward(params, tokens, h0, c0)
    assert decoded.shape == (SEQ, BATCH, NTOKEN)
    assert hN.shape == (NLAYERS, BATCH, NHID) and cN.shape == (NLAYERS, BATCH, NHID)
    assert jnp.allclose(decoded, ref_dec, rtol=1e-4, atol=1e-4)
    assert jnp.allclose(hN, ref_h, rtol=1e-4, atol=1e-4)
    assert jnp.allclose(cN, ref_c, rtol=1e-4, atol=1e-4)

    print("KERNEL_OK")
</pallas_src>

<mosaic_0001>
module attributes {stable_mosaic.version = 11 : i64} {
  func.func @_fused_forward_kernel(%arg0: memref<64x1xi32, #tpu.memory_space<vmem>>, %arg1: memref<128x32xf32, #tpu.memory_space<vmem>>, %arg2: memref<32x128xf32, #tpu.memory_space<vmem>>, %arg3: memref<32x128xf32, #tpu.memory_space<vmem>>, %arg4: memref<1x128xf32, #tpu.memory_space<vmem>>, %arg5: memref<64x128xf32, #tpu.memory_space<vmem>>, %arg6: memref<1x128xf32, #tpu.memory_space<vmem>>, %arg7: memref<2x8x32xf32, #tpu.memory_space<vmem>>, %arg8: memref<2x8x32xf32, #tpu.memory_space<vmem>>, %arg9: memref<32x128xf32, #tpu.memory_space<vmem>>, %arg10: memref<1x128xf32, #tpu.memory_space<vmem>>, %arg11: memref<128x128xf32, #tpu.memory_space<vmem>>, %arg12: memref<1x128xf32, #tpu.memory_space<vmem>>, %arg13: memref<64x128xf32, #tpu.memory_space<vmem>>, %arg14: memref<8x128xf32, #tpu.memory_space<vmem>>, %arg15: memref<64x128xf32, #tpu.memory_space<vmem>>) attributes {dimension_semantics = [], scalar_prefetch = 0 : i64, scratch_operands = 1 : i64, tpu.core_type = #tpu.core_type<tc>} {
    %c0 = arith.constant 0 : index
    %c0_0 = arith.constant 0 : index
    %0 = vector.load %arg0[%c0, %c0_0] : memref<64x1xi32, #tpu.memory_space<vmem>>, vector<64x1xi32>
    %1 = tpu.iota {dimensions = array<i32: 1>} : vector<64x128xi32>
    %2 = vector.broadcast %0 : vector<64x1xi32> to vector<64x128xi32>
    %3 = arith.cmpi eq, %1, %2 : vector<64x128xi32>
    %4 = arith.extui %3 : vector<64x128xi1> to vector<64x128xi32>
    %5 = arith.sitofp %4 : vector<64x128xi32> to vector<64x128xf32>
    %c0_1 = arith.constant 0 : index
    %c0_2 = arith.constant 0 : index
    %6 = vector.load %arg1[%c0_1, %c0_2] : memref<128x32xf32, #tpu.memory_space<vmem>>, vector<128x32xf32>
    %cst = arith.constant dense<0.000000e+00> : vector<64x32xf32>
    %7 = tpu.matmul %5, %6, %cst {dimension_numbers = #tpu.dot_dimension_numbers<[1], [0], [0], [1], [0, 0, 1, 1], [], []>} : vector<64x128xf32>, vector<128x32xf32>, vector<64x32xf32> -> vector<64x32xf32>
    %c0_3 = arith.constant 0 : index
    %c0_4 = arith.constant 0 : index
    %8 = vector.load %arg2[%c0_3, %c0_4] : memref<32x128xf32, #tpu.memory_space<vmem>>, vector<32x128xf32>
    %cst_5 = arith.constant dense<0.000000e+00> : vector<64x128xf32>
    %9 = tpu.matmul %7, %8, %cst_5 {dimension_numbers = #tpu.dot_dimension_numbers<[1], [0], [0], [1], [0, 0, 1, 1], [], []>} : vector<64x32xf32>, vector<32x128xf32>, vector<64x128xf32> -> vector<64x128xf32>
    %c0_6 = arith.constant 0 : index
    %c0_7 = arith.constant 0 : index
    %10 = vector.load %arg4[%c0_6, %c0_7] : memref<1x128xf32, #tpu.memory_space<vmem>>, vector<1x128xf32>
    %11 = vector.broadcast %10 : vector<1x128xf32> to vector<64x128xf32>
    %12 = arith.addf %9, %11 : vector<64x128xf32>
    %c0_8 = arith.constant 0 : index
    %c0_9 = arith.constant 0 : index
    %13 = vector.load %arg15[%c0_8, %c0_9] : memref<64x128xf32, #tpu.memory_space<vmem>>, vector<64x128xf32>
    tpu.vector_store %arg15[%c0_8, %c0_9], %12 {strides = array<i32>} : memref<64x128xf32, #tpu.memory_space<vmem>>, vector<64x128xf32>,
    %c0_10 = arith.constant 0 : index
    %c0_11 = arith.constant 0 : index
    %c0_12 = arith.constant 0 : index
    %14 = vector.load %arg7[%c0_10, %c0_11, %c0_12] : memref<2x8x32xf32, #tpu.memory_space<vmem>>, vector<1x8x32xf32>
    %15 = vector.shape_cast %14 : vector<1x8x32xf32> to vector<8x32xf32>
    %c0_13 = arith.constant 0 : index
    %c0_14 = arith.constant 0 : index
    %c0_15 = arith.constant 0 : index
    %16 = vector.load %arg8[%c0_13, %c0_14, %c0_15] : memref<2x8x32xf32, #tpu.memory_space<vmem>>, vector<1x8x32xf32>
    %17 = vector.shape_cast %16 : vector<1x8x32xf32> to vector<8x32xf32>
    %c1 = arith.constant 1 : index
    %c0_16 = arith.constant 0 : index
    %c0_17 = arith.constant 0 : index
    %18 = vector.load %arg7[%c1, %c0_16, %c0_17] : memref<2x8x32xf32, #tpu.memory_space<vmem>>, vector<1x8x32xf32>
    %19 = vector.shape_cast %18 : vector<1x8x32xf32> to vector<8x32xf32>
    %c1_18 = arith.constant 1 : index
    %c0_19 = arith.constant 0 : index
    %c0_20 = arith.constant 0 : index
    %20 = vector.load %arg8[%c1_18, %c0_19, %c0_20] : memref<2x8x32xf32, #tpu.memory_space<vmem>>, vector<1x8x32xf32>
    %21 = vector.shape_cast %20 : vector<1x8x32xf32> to vector<8x32xf32>
    %c0_21 = arith.constant 0 : index
    %c0_22 = arith.constant 0 : index
    %22 = vector.load %arg15[%c0_21, %c0_22] : memref<64x128xf32, #tpu.memory_space<vmem>>, vector<8x128xf32>
    %c0_23 = arith.constant 0 : index
    %c0_24 = arith.constant 0 : index
    %23 = vector.load %arg3[%c0_23, %c0_24] : memref<32x128xf32, #tpu.memory_space<vmem>>, vector<32x128xf32>
    %cst_25 = arith.constant dense<0.000000e+00> : vector<8x128xf32>
    %24 = tpu.matmul %15, %23, %cst_25 {dimension_numbers = #tpu.dot_dimension_numbers<[1], [0], [0], [1], [0, 0, 1, 1], [], []>} : vector<8x32xf32>, vector<32x128xf32>, vector<8x128xf32> -> vector<8x128xf32>
    %25 = arith.addf %22, %24 : vector<8x128xf32>
    %26 = arith.negf %25 : vector<8x128xf32>
    %27 = math.exp %26 : vector<8x128xf32>
    %cst_26 = arith.constant 1.000000e+00 : f32
    %28 = vector.broadcast %cst_26 : f32 to vector<8x128xf32>
    %29 = arith.addf %28, %27 : vector<8x128xf32>
    %30 = arith.divf %28, %29 : vector<8x128xf32>
    %31 = math.tanh %25 : vector<8x128xf32>
    %32 = vector.extract_strided_slice %30 {offsets = [0, 0], sizes = [8, 32], strides = [1, 1]} : vector<8x128xf32> to vector<8x32xf32>
    %33 = vector.extract_strided_slice %30 {offsets = [0, 32], sizes = [8, 32], strides = [1, 1]} : vector<8x128xf32> to vector<8x32xf32>
    %34 = vector.extract_strided_slice %31 {offsets = [0, 64], sizes = [8, 32], strides = [1, 1]} : vector<8x128xf32> to vector<8x32xf32>
    %35 = vector.extract_strided_slice %30 {offsets = [0, 96], sizes = [8, 32], strides = [1, 1]} : vector<8x128xf32> to vector<8x32xf32>
    %36 = arith.mulf %33, %17 : vector<8x32xf32>
    %37 = arith.mulf %32, %34 : vector<8x32xf32>
    %38 = arith.addf %36, %37 : vector<8x32xf32>
    %39 = math.tanh %38 : vector<8x32xf32>
    %40 = arith.mulf %35, %39 : vector<8x32xf32>
    %41 = tpu.concatenate %40, %19 in 1 : vector<8x32xf32>, vector<8x32xf32> -> vector<8x64xf32>
    %c0_27 = arith.constant 0 : index
    %c0_28 = arith.constant 0 : index
    %42 = vector.load %arg5[%c0_27, %c0_28] : memref<64x128xf32, #tpu.memory_space<vmem>>, vector<64x128xf32>
    %cst_29 = arith.constant dense<0.000000e+00> : vector<8x128xf32>
    %43 = tpu.matmul %41, %42, %cst_29 {dimension_numbers = #tpu.dot_dimension_numbers<[1], [0], [0], [1], [0, 0, 1, 1], [], []>} : vector<8x64xf32>, vector<64x128xf32>, vector<8x128xf32> -> vector<8x128xf32>
    %c0_30 = arith.constant 0 : index
    %c0_31 = arith.constant 0 : index
    %44 = vector.load %arg6[%c0_30, %c0_31] : memref<1x128xf32, #tpu.memory_space<vmem>>, vector<1x128xf32>
    %45 = vector.broadcast %44 : vector<1x128xf32> to vector<8x128xf32>
    %46 = arith.addf %43, %45 : vector<8x128xf32>
    %47 = arith.negf %46 : vector<8x128xf32>
    %48 = math.exp %47 : vector<8x128xf32>
    %cst_32 = arith.constant 1.000000e+00 : f32
    %49 = vector.broadcast %cst_32 : f32 to vector<8x128xf32>
    %50 = arith.addf %49, %48 : vector<8x128xf32>
    %51 = arith.divf %49, %50 : vector<8x128xf32>
    %52 = math.tanh %46 : vector<8x128xf32>
    %53 = vector.extract_strided_slice %51 {offsets = [0, 0], sizes = [8, 32], strides = [1, 1]} : vector<8x128xf32> to vector<8x32xf32>
    %54 = vector.extract_strided_slice %51 {offsets = [0, 32], sizes = [8, 32], strides = [1, 1]} : vector<8x128xf32> to vector<8x32xf32>
    %55 = vector.extract_strided_slice %52 {offsets = [0, 64], sizes = [8, 32], strides = [1, 1]} : vector<8x128xf32> to vector<8x32xf32>
    %56 = vector.extract_strided_slice %51 {offsets = [0, 96], sizes = [8, 32], strides = [1, 1]} : vector<8x128xf32> to vector<8x32xf32>
    %57 = arith.mulf %54, %21 : vector<8x32xf32>
    %58 = arith.mulf %53, %55 : vector<8x32xf32>
    %59 = arith.addf %57, %58 : vector<8x32xf32>
    %60 = math.tanh %59 : vector<8x32xf32>
    %61 = arith.mulf %56, %60 : vector<8x32xf32>
    %c0_33 = arith.constant 0 : index
    %c0_34 = arith.constant 0 : index
    %62 = vector.load %arg9[%c0_33, %c0_34] : memref<32x128xf32, #tpu.memory_space<vmem>>, vector<32x128xf32>
    %cst_35 = arith.constant dense<0.000000e+00> : vector<8x128xf32>
    %63 = tpu.matmul %61, %62, %cst_35 {dimension_numbers = #tpu.dot_dimension_numbers<[1], [0], [0], [1], [0, 0, 1, 1], [], []>} : vector<8x32xf32>, vector<32x128xf32>, vector<8x128xf32> -> vector<8x128xf32>
    %c0_36 = arith.constant 0 : index
    %c0_37 = arith.constant 0 : index
    %64 = vector.load %arg10[%c0_36, %c0_37] : memref<1x128xf32, #tpu.memory_space<vmem>>, vector<1x128xf32>
    %65 = vector.broadcast %64 : vector<1x128xf32> to vector<8x128xf32>
    %66 = arith.addf %63, %65 : vector<8x128xf32>
    %c0_38 = arith.constant 0 : index
    %c0_39 = arith.constant 0 : index
    %67 = vector.load %arg11[%c0_38, %c0_39] : memref<128x128xf32, #tpu.memory_space<vmem>>, vector<128x128xf32>
    %cst_40 = arith.constant dense<0.000000e+00> : vector<8x128xf32>
    %68 = tpu.matmul %66, %67, %cst_40 {dimension_numbers = #tpu.dot_dimension_numbers<[1], [0], [0], [1], [0, 0, 1, 1], [], []>} : vector<8x128xf32>, vector<128x128xf32>, vector<8x128xf32> -> vector<8x128xf32>
    %c0_41 = arith.constant 0 : index
    %c0_42 = arith.constant 0 : index
    %69 = vector.load %arg12[%c0_41, %c0_42] : memref<1x128xf32, #tpu.memory_space<vmem>>, vector<1x128xf32>
    %70 = vector.broadcast %69 : vector<1x128xf32> to vector<8x128xf32>
    %71 = arith.addf %68, %70 : vector<8x128xf32>
    %c0_43 = arith.constant 0 : index
    %c0_44 = arith.constant 0 : index
    %72 = vector.load %arg13[%c0_43, %c0_44] : memref<64x128xf32, #tpu.memory_space<vmem>>, vector<8x128xf32>
    tpu.vector_store %arg13[%c0_43, %c0_44], %71 {strides = array<i32>} : memref<64x128xf32, #tpu.memory_space<vmem>>, vector<8x128xf32>,
    %c8 = arith.constant 8 : index
    %c0_45 = arith.constant 0 : index
    %73 = vector.load %arg15[%c8, %c0_45] : memref<64x128xf32, #tpu.memory_space<vmem>>, vector<8x128xf32>
    %c0_46 = arith.constant 0 : index
    %c0_47 = arith.constant 0 : index
    %74 = vector.load %arg3[%c0_46, %c0_47] : memref<32x128xf32, #tpu.memory_space<vmem>>, vector<32x128xf32>
    %cst_48 = arith.constant dense<0.000000e+00> : vector<8x128xf32>
    %75 = tpu.matmul %40, %74, %cst_48 {dimension_numbers = #tpu.dot_dimension_numbers<[1], [0], [0], [1], [0, 0, 1, 1], [], []>} : vector<8x32xf32>, vector<32x128xf32>, vector<8x128xf32> -> vector<8x128xf32>
    %76 = arith.addf %73, %75 : vector<8x128xf32>
    %77 = arith.negf %76 : vector<8x128xf32>
    %78 = math.exp %77 : vector<8x128xf32>
    %cst_49 = arith.constant 1.000000e+00 : f32
    %79 = vector.broadcast %cst_49 : f32 to vector<8x128xf32>
    %80 = arith.addf %79, %78 : vector<8x128xf32>
    %81 = arith.divf %79, %80 : vector<8x128xf32>
    %82 = math.tanh %76 : vector<8x128xf32>
    %83 = vector.extract_strided_slice %81 {offsets = [0, 0], sizes = [8, 32], strides = [1, 1]} : vector<8x128xf32> to vector<8x32xf32>
    %84 = vector.extract_strided_slice %81 {offsets = [0, 32], sizes = [8, 32], strides = [1, 1]} : vector<8x128xf32> to vector<8x32xf32>
    %85 = vector.extract_strided_slice %82 {offsets = [0, 64], sizes = [8, 32], strides = [1, 1]} : vector<8x128xf32> to vector<8x32xf32>
    %86 = vector.extract_strided_slice %81 {offsets = [0, 96], sizes = [8, 32], strides = [1, 1]} : vector<8x128xf32> to vector<8x32xf32>
    %87 = arith.mulf %84, %38 : vector<8x32xf32>
    %88 = arith.mulf %83, %85 : vector<8x32xf32>
    %89 = arith.addf %87, %88 : vector<8x32xf32>
    %90 = math.tanh %89 : vector<8x32xf32>
    %91 = arith.mulf %86, %90 : vector<8x32xf32>
    %92 = tpu.concatenate %91, %61 in 1 : vector<8x32xf32>, vector<8x32xf32> -> vector<8x64xf32>
    %c0_50 = arith.constant 0 : index
    %c0_51 = arith.constant 0 : index
    %93 = vector.load %arg5[%c0_50, %c0_51] : memref<64x128xf32, #tpu.memory_space<vmem>>, vector<64x128xf32>
    %cst_52 = arith.constant dense<0.000000e+00> : vector<8x128xf32>
    %94 = tpu.matmul %92, %93, %cst_52 {dimension_numbers = #tpu.dot_dimension_numbers<[1], [0], [0], [1], [0, 0, 1, 1], [], []>} : vector<8x64xf32>, vector<64x128xf32>, vector<8x128xf32> -> vector<8x128xf32>
    %c0_53 = arith.constant 0 : index
    %c0_54 = arith.constant 0 : index
    %95 = vector.load %arg6[%c0_53, %c0_54] : memref<1x128xf32, #tpu.memory_space<vmem>>, vector<1x128xf32>
    %96 = vector.broadcast %95 : vector<1x128xf32> to vector<8x128xf32>
    %97 = arith.addf %94, %96 : vector<8x128xf32>
    %98 = arith.negf %97 : vector<8x128xf32>
    %99 = math.exp %98 : vector<8x128xf32>
    %cst_55 = arith.constant 1.000000e+00 : f32
    %100 = vector.broadcast %cst_55 : f32 to vector<8x128xf32>
    %101 = arith.addf %100, %99 : vector<8x128xf32>
    %102 = arith.divf %100, %101 : vector<8x128xf32>
    %103 = math.tanh %97 : vector<8x128xf32>
    %104 = vector.extract_strided_slice %102 {offsets = [0, 0], sizes = [8, 32], strides = [1, 1]} : vector<8x128xf32> to vector<8x32xf32>
    %105 = vector.extract_strided_slice %102 {offsets = [0, 32], sizes = [8, 32], strides = [1, 1]} : vector<8x128xf32> to vector<8x32xf32>
    %106 = vector.extract_strided_slice %103 {offsets = [0, 64], sizes = [8, 32], strides = [1, 1]} : vector<8x128xf32> to vector<8x32xf32>
    %107 = vector.extract_strided_slice %102 {offsets = [0, 96], sizes = [8, 32], strides = [1, 1]} : vector<8x128xf32> to vector<8x32xf32>
    %108 = arith.mulf %105, %59 : vector<8x32xf32>
    %109 = arith.mulf %104, %106 : vector<8x32xf32>
    %110 = arith.addf %108, %109 : vector<8x32xf32>
    %111 = math.tanh %110 : vector<8x32xf32>
    %112 = arith.mulf %107, %111 : vector<8x32xf32>
    %c0_56 = arith.constant 0 : index
    %c0_57 = arith.constant 0 : index
    %113 = vector.load %arg9[%c0_56, %c0_57] : memref<32x128xf32, #tpu.memory_space<vmem>>, vector<32x128xf32>
    %cst_58 = arith.constant dense<0.000000e+00> : vector<8x128xf32>
    %114 = tpu.matmul %112, %113, %cst_58 {dimension_numbers = #tpu.dot_dimension_numbers<[1], [0], [0], [1], [0, 0, 1, 1], [], []>} : vector<8x32xf32>, vector<32x128xf32>, vector<8x128xf32> -> vector<8x128xf32>
    %c0_59 = arith.constant 0 : index
    %c0_60 = arith.constant 0 : index
    %115 = vector.load %arg10[%c0_59, %c0_60] : memref<1x128xf32, #tpu.memory_space<vmem>>, vector<1x128xf32>
    %116 = vector.broadcast %115 : vector<1x128xf32> to vector<8x128xf32>
    %117 = arith.addf %114, %116 : vector<8x128xf32>
    %c0_61 = arith.constant 0 : index
    %c0_62 = arith.constant 0 : index
    %118 = vector.load %arg11[%c0_61, %c0_62] : memref<128x128xf32, #tpu.memory_space<vmem>>, vector<128x128xf32>
    %cst_63 = arith.constant dense<0.000000e+00> : vector<8x128xf32>
    %119 = tpu.matmul %117, %118, %cst_63 {dimension_numbers = #tpu.dot_dimension_numbers<[1], [0], [0], [1], [0, 0, 1, 1], [], []>} : vector<8x128xf32>, vector<128x128xf32>, vector<8x128xf32> -> vector<8x128xf32>
    %c0_64 = arith.constant 0 : index
    %c0_65 = arith.constant 0 : index
    %120 = vector.load %arg12[%c0_64, %c0_65] : memref<1x128xf32, #tpu.memory_space<vmem>>, vector<1x128xf32>
    %121 = vector.broadcast %120 : vector<1x128xf32> to vector<8x128xf32>
    %122 = arith.addf %119, %121 : vector<8x128xf32>
    %c8_66 = arith.constant 8 : index
    %c0_67 = arith.constant 0 : index
    %123 = vector.load %arg13[%c8_66, %c0_67] : memref<64x128xf32, #tpu.memory_space<vmem>>, vector<8x128xf32>
    tpu.vector_store %arg13[%c8_66, %c0_67], %122 {strides = array<i32>} : memref<64x128xf32, #tpu.memory_space<vmem>>, vector<8x128xf32>,
    %c16 = arith.constant 16 : index
    %c0_68 = arith.constant 0 : index
    %124 = vector.load %arg15[%c16, %c0_68] : memref<64x128xf32, #tpu.memory_space<vmem>>, vector<8x128xf32>
    %c0_69 = arith.constant 0 : index
    %c0_70 = arith.constant 0 : index
    %125 = vector.load %arg3[%c0_69, %c0_70] : memref<32x128xf32, #tpu.memory_space<vmem>>, vector<32x128xf32>
    %cst_71 = arith.constant dense<0.000000e+00> : vector<8x128xf32>
    %126 = tpu.matmul %91, %125, %cst_71 {dimension_numbers = #tpu.dot_dimension_numbers<[1], [0], [0], [1], [0, 0, 1, 1], [], []>} : vector<8x32xf32>, vector<32x128xf32>, vector<8x128xf32> -> vector<8x128xf32>
    %127 = arith.addf %124, %126 : vector<8x128xf32>
    %128 = arith.negf %127 : vector<8x128xf32>
    %129 = math.exp %128 : vector<8x128xf32>
    %cst_72 = arith.constant 1.000000e+00 : f32
    %130 = vector.broadcast %cst_72 : f32 to vector<8x128xf32>
    %131 = arith.addf %130, %129 : vector<8x128xf32>
    %132 = arith.divf %130, %131 : vector<8x128xf32>
    %133 = math.tanh %127 : vector<8x128xf32>
    %134 = vector.extract_strided_slice %132 {offsets = [0, 0], sizes = [8, 32], strides = [1, 1]} : vector<8x128xf32> to vector<8x32xf32>
    %135 = vector.extract_strided_slice %132 {offsets = [0, 32], sizes = [8, 32], strides = [1, 1]} : vector<8x128xf32> to vector<8x32xf32>
    %136 = vector.extract_strided_slice %133 {offsets = [0, 64], sizes = [8, 32], strides = [1, 1]} : vector<8x128xf32> to vector<8x32xf32>
    %137 = vector.extract_strided_slice %132 {offsets = [0, 96], sizes = [8, 32], strides = [1, 1]} : vector<8x128xf32> to vector<8x32xf32>
    %138 = arith.mulf %135, %89 : vector<8x32xf32>
    %139 = arith.mulf %134, %136 : vector<8x32xf32>
    %140 = arith.addf %138, %139 : vector<8x32xf32>
    %141 = math.tanh %140 : vector<8x32xf32>
    %142 = arith.mulf %137, %141 : vector<8x32xf32>
    %143 = tpu.concatenate %142, %112 in 1 : vector<8x32xf32>, vector<8x32xf32> -> vector<8x64xf32>
    %c0_73 = arith.constant 0 : index
    %c0_74 = arith.constant 0 : index
    %144 = vector.load %arg5[%c0_73, %c0_74] : memref<64x128xf32, #tpu.memory_space<vmem>>, vector<64x128xf32>
    %cst_75 = arith.constant dense<0.000000e+00> : vector<8x128xf32>
    %145 = tpu.matmul %143, %144, %cst_75 {dimension_numbers = #tpu.dot_dimension_numbers<[1], [0], [0], [1], [0, 0, 1, 1], [], []>} : vector<8x64xf32>, vector<64x128xf32>, vector<8x128xf32> -> vector<8x128xf32>
    %c0_76 = arith.constant 0 : index
    %c0_77 = arith.constant 0 : index
    %146 = vector.load %arg6[%c0_76, %c0_77] : memref<1x128xf32, #tpu.memory_space<vmem>>, vector<1x128xf32>
    %147 = vector.broadcast %146 : vector<1x128xf32> to vector<8x128xf32>
    %148 = arith.addf %145, %147 : vector<8x128xf32>
    %149 = arith.negf %148 : vector<8x128xf32>
    %150 = math.exp %149 : vector<8x128xf32>
    %cst_78 = arith.constant 1.000000e+00 : f32
    %151 = vector.broadcast %cst_78 : f32 to vector<8x128xf32>
    %152 = arith.addf %151, %150 : vector<8x128xf32>
    %153 = arith.divf %151, %152 : vector<8x128xf32>
    %154 = math.tanh %148 : vector<8x128xf32>
    %155 = vector.extract_strided_slice %153 {offsets = [0, 0], sizes = [8, 32], strides = [1, 1]} : vector<8x128xf32> to vector<8x32xf32>
    %156 = vector.extract_strided_slice %153 {offsets = [0, 32], sizes = [8, 32], strides = [1, 1]} : vector<8x128xf32> to vector<8x32xf32>
    %157 = vector.extract_strided_slice %154 {offsets = [0, 64], sizes = [8, 32], strides = [1, 1]} : vector<8x128xf32> to vector<8x32xf32>
    %158 = vector.extract_strided_slice %153 {offsets = [0, 96], sizes = [8, 32], strides = [1, 1]} : vector<8x128xf32> to vector<8x32xf32>
    %159 = arith.mulf %156, %110 : vector<8x32xf32>
    %160 = arith.mulf %155, %157 : vector<8x32xf32>
    %161 = arith.addf %159, %160 : vector<8x32xf32>
    %162 = math.tanh %161 : vector<8x32xf32>
    %163 = arith.mulf %158, %162 : vector<8x32xf32>
    %c0_79 = arith.constant 0 : index
    %c0_80 = arith.constant 0 : index
    %164 = vector.load %arg9[%c0_79, %c0_80] : memref<32x128xf32, #tpu.memory_space<vmem>>, vector<32x128xf32>
    %cst_81 = arith.constant dense<0.000000e+00> : vector<8x128xf32>
    %165 = tpu.matmul %163, %164, %cst_81 {dimension_numbers = #tpu.dot_dimension_numbers<[1], [0], [0], [1], [0, 0, 1, 1], [], []>} : vector<8x32xf32>, vector<32x128xf32>, vector<8x128xf32> -> vector<8x128xf32>
    %c0_82 = arith.constant 0 : index
    %c0_83 = arith.constant 0 : index
    %166 = vector.load %arg10[%c0_82, %c0_83] : memref<1x128xf32, #tpu.memory_space<vmem>>, vector<1x128xf32>
    %167 = vector.broadcast %166 : vector<1x128xf32> to vector<8x128xf32>
    %168 = arith.addf %165, %167 : vector<8x128xf32>
    %c0_84 = arith.constant 0 : index
    %c0_85 = arith.constant 0 : index
    %169 = vector.load %arg11[%c0_84, %c0_85] : memref<128x128xf32, #tpu.memory_space<vmem>>, vector<128x128xf32>
    %cst_86 = arith.constant dense<0.000000e+00> : vector<8x128xf32>
    %170 = tpu.matmul %168, %169, %cst_86 {dimension_numbers = #tpu.dot_dimension_numbers<[1], [0], [0], [1], [0, 0, 1, 1], [], []>} : vector<8x128xf32>, vector<128x128xf32>, vector<8x128xf32> -> vector<8x128xf32>
    %c0_87 = arith.constant 0 : index
    %c0_88 = arith.constant 0 : index
    %171 = vector.load %arg12[%c0_87, %c0_88] : memref<1x128xf32, #tpu.memory_space<vmem>>, vector<1x128xf32>
    %172 = vector.broadcast %171 : vector<1x128xf32> to vector<8x128xf32>
    %173 = arith.addf %170, %172 : vector<8x128xf32>
    %c16_89 = arith.constant 16 : index
    %c0_90 = arith.constant 0 : index
    %174 = vector.load %arg13[%c16_89, %c0_90] : memref<64x128xf32, #tpu.memory_space<vmem>>, vector<8x128xf32>
    tpu.vector_store %arg13[%c16_89, %c0_90], %173 {strides = array<i32>} : memref<64x128xf32, #tpu.memory_space<vmem>>, vector<8x128xf32>,
    %c24 = arith.constant 24 : index
    %c0_91 = arith.constant 0 : index
    %175 = vector.load %arg15[%c24, %c0_91] : memref<64x128xf32, #tpu.memory_space<vmem>>, vector<8x128xf32>
    %c0_92 = arith.constant 0 : index
    %c0_93 = arith.constant 0 : index
    %176 = vector.load %arg3[%c0_92, %c0_93] : memref<32x128xf32, #tpu.memory_space<vmem>>, vector<32x128xf32>
    %cst_94 = arith.constant dense<0.000000e+00> : vector<8x128xf32>
    %177 = tpu.matmul %142, %176, %cst_94 {dimension_numbers = #tpu.dot_dimension_numbers<[1], [0], [0], [1], [0, 0, 1, 1], [], []>} : vector<8x32xf32>, vector<32x128xf32>, vector<8x128xf32> -> vector<8x128xf32>
    %178 = arith.addf %175, %177 : vector<8x128xf32>
    %179 = arith.negf %178 : vector<8x128xf32>
    %180 = math.exp %179 : vector<8x128xf32>
    %cst_95 = arith.constant 1.000000e+00 : f32
    %181 = vector.broadcast %cst_95 : f32 to vector<8x128xf32>
    %182 = arith.addf %181, %180 : vector<8x128xf32>
    %183 = arith.divf %181, %182 : vector<8x128xf32>
    %184 = math.tanh %178 : vector<8x128xf32>
    %185 = vector.extract_strided_slice %183 {offsets = [0, 0], sizes = [8, 32], strides = [1, 1]} : vector<8x128xf32> to vector<8x32xf32>
    %186 = vector.extract_strided_slice %183 {offsets = [0, 32], sizes = [8, 32], strides = [1, 1]} : vector<8x128xf32> to vector<8x32xf32>
    %187 = vector.extract_strided_slice %184 {offsets = [0, 64], sizes = [8, 32], strides = [1, 1]} : vector<8x128xf32> to vector<8x32xf32>
    %188 = vector.extract_strided_slice %183 {offsets = [0, 96], sizes = [8, 32], strides = [1, 1]} : vector<8x128xf32> to vector<8x32xf32>
    %189 = arith.mulf %186, %140 : vector<8x32xf32>
    %190 = arith.mulf %185, %187 : vector<8x32xf32>
    %191 = arith.addf %189, %190 : vector<8x32xf32>
    %192 = math.tanh %191 : vector<8x32xf32>
    %193 = arith.mulf %188, %192 : vector<8x32xf32>
    %194 = tpu.concatenate %193, %163 in 1 : vector<8x32xf32>, vector<8x32xf32> -> vector<8x64xf32>
    %c0_96 = arith.constant 0 : index
    %c0_97 = arith.constant 0 : index
    %195 = vector.load %arg5[%c0_96, %c0_97] : memref<64x128xf32, #tpu.memory_space<vmem>>, vector<64x128xf32>
    %cst_98 = arith.constant dense<0.000000e+00> : vector<8x128xf32>
    %196 = tpu.matmul %194, %195, %cst_98 {dimension_numbers = #tpu.dot_dimension_numbers<[1], [0], [0], [1], [0, 0, 1, 1], [], []>} : vector<8x64xf32>, vector<64x128xf32>, vector<8x128xf32> -> vector<8x128xf32>
    %c0_99 = arith.constant 0 : index
    %c0_100 = arith.constant 0 : index
    %197 = vector.load %arg6[%c0_99, %c0_100] : memref<1x128xf32, #tpu.memory_space<vmem>>, vector<1x128xf32>
    %198 = vector.broadcast %197 : vector<1x128xf32> to vector<8x128xf32>
    %199 = arith.addf %196, %198 : vector<8x128xf32>
    %200 = arith.negf %199 : vector<8x128xf32>
    %201 = math.exp %200 : vector<8x128xf32>
    %cst_101 = arith.constant 1.000000e+00 : f32
    %202 = vector.broadcast %cst_101 : f32 to vector<8x128xf32>
    %203 = arith.addf %202, %201 : vector<8x128xf32>
    %204 = arith.divf %202, %203 : vector<8x128xf32>
    %205 = math.tanh %199 : vector<8x128xf32>
    %206 = vector.extract_strided_slice %204 {offsets = [0, 0], sizes = [8, 32], strides = [1, 1]} : vector<8x128xf32> to vector<8x32xf32>
    %207 = vector.extract_strided_slice %204 {offsets = [0, 32], sizes = [8, 32], strides = [1, 1]} : vector<8x128xf32> to vector<8x32xf32>
    %208 = vector.extract_strided_slice %205 {offsets = [0, 64], sizes = [8, 32], strides = [1, 1]} : vector<8x128xf32> to vector<8x32xf32>
    %209 = vector.extract_strided_slice %204 {offsets = [0, 96], sizes = [8, 32], strides = [1, 1]} : vector<8x128xf32> to vector<8x32xf32>
    %210 = arith.mulf %207, %161 : vector<8x32xf32>
    %211 = arith.mulf %206, %208 : vector<8x32xf32>
    %212 = arith.addf %210, %211 : vector<8x32xf32>
    %213 = math.tanh %212 : vector<8x32xf32>
    %214 = arith.mulf %209, %213 : vector<8x32xf32>
    %c0_102 = arith.constant 0 : index
    %c0_103 = arith.constant 0 : index
    %215 = vector.load %arg9[%c0_102, %c0_103] : memref<32x128xf32, #tpu.memory_space<vmem>>, vector<32x128xf32>
    %cst_104 = arith.constant dense<0.000000e+00> : vector<8x128xf32>
    %216 = tpu.matmul %214, %215, %cst_104 {dimension_numbers = #tpu.dot_dimension_numbers<[1], [0], [0], [1], [0, 0, 1, 1], [], []>} : vector<8x32xf32>, vector<32x128xf32>, vector<8x128xf32> -> vector<8x128xf32>
    %c0_105 = arith.constant 0 : index
    %c0_106 = arith.constant 0 : index
    %217 = vector.load %arg10[%c0_105, %c0_106] : memref<1x128xf32, #tpu.memory_space<vmem>>, vector<1x128xf32>
    %218 = vector.broadcast %217 : vector<1x128xf32> to vector<8x128xf32>
    %219 = arith.addf %216, %218 : vector<8x128xf32>
    %c0_107 = arith.constant 0 : index
    %c0_108 = arith.constant 0 : index
    %220 = vector.load %arg11[%c0_107, %c0_108] : memref<128x128xf32, #tpu.memory_space<vmem>>, vector<128x128xf32>
    %cst_109 = arith.constant dense<0.000000e+00> : vector<8x128xf32>
    %221 = tpu.matmul %219, %220, %cst_109 {dimension_numbers = #tpu.dot_dimension_numbers<[1], [0], [0], [1], [0, 0, 1, 1], [], []>} : vector<8x128xf32>, vector<128x128xf32>, vector<8x128xf32> -> vector<8x128xf32>
    %c0_110 = arith.constant 0 : index
    %c0_111 = arith.constant 0 : index
    %222 = vector.load %arg12[%c0_110, %c0_111] : memref<1x128xf32, #tpu.memory_space<vmem>>, vector<1x128xf32>
    %223 = vector.broadcast %222 : vector<1x128xf32> to vector<8x128xf32>
    %224 = arith.addf %221, %223 : vector<8x128xf32>
    %c24_112 = arith.constant 24 : index
    %c0_113 = arith.constant 0 : index
    %225 = vector.load %arg13[%c24_112, %c0_113] : memref<64x128xf32, #tpu.memory_space<vmem>>, vector<8x128xf32>
    tpu.vector_store %arg13[%c24_112, %c0_113], %224 {strides = array<i32>} : memref<64x128xf32, #tpu.memory_space<vmem>>, vector<8x128xf32>,
    %c32 = arith.constant 32 : index
    %c0_114 = arith.constant 0 : index
    %226 = vector.load %arg15[%c32, %c0_114] : memref<64x128xf32, #tpu.memory_space<vmem>>, vector<8x128xf32>
    %c0_115 = arith.constant 0 : index
    %c0_116 = arith.constant 0 : index
    %227 = vector.load %arg3[%c0_115, %c0_116] : memref<32x128xf32, #tpu.memory_space<vmem>>, vector<32x128xf32>
    %cst_117 = arith.constant dense<0.000000e+00> : vector<8x128xf32>
    %228 = tpu.matmul %193, %227, %cst_117 {dimension_numbers = #tpu.dot_dimension_numbers<[1], [0], [0], [1], [0, 0, 1, 1], [], []>} : vector<8x32xf32>, vector<32x128xf32>, vector<8x128xf32> -> vector<8x128xf32>
    %229 = arith.addf %226, %228 : vector<8x128xf32>
    %230 = arith.negf %229 : vector<8x128xf32>
    %231 = math.exp %230 : vector<8x128xf32>
    %cst_118 = arith.constant 1.000000e+00 : f32
    %232 = vector.broadcast %cst_118 : f32 to vector<8x128xf32>
    %233 = arith.addf %232, %231 : vector<8x128xf32>
    %234 = arith.divf %232, %233 : vector<8x128xf32>
    %235 = math.tanh %229 : vector<8x128xf32>
    %236 = vector.extract_strided_slice %234 {offsets = [0, 0], sizes = [8, 32], strides = [1, 1]} : vector<8x128xf32> to vector<8x32xf32>
    %237 = vector.extract_strided_slice %234 {offsets = [0, 32], sizes = [8, 32], strides = [1, 1]} : vector<8x128xf32> to vector<8x32xf32>
    %238 = vector.extract_strided_slice %235 {offsets = [0, 64], sizes = [8, 32], strides = [1, 1]} : vector<8x128xf32> to vector<8x32xf32>
    %239 = vector.extract_strided_slice %234 {offsets = [0, 96], sizes = [8, 32], strides = [1, 1]} : vector<8x128xf32> to vector<8x32xf32>
    %240 = arith.mulf %237, %191 : vector<8x32xf32>
    %241 = arith.mulf %236, %238 : vector<8x32xf32>
    %242 = arith.addf %240, %241 : vector<8x32xf32>
    %243 = math.tanh %242 : vector<8x32xf32>
    %244 = arith.mulf %239, %243 : vector<8x32xf32>
    %245 = tpu.concatenate %244, %214 in 1 : vector<8x32xf32>, vector<8x32xf32> -> vector<8x64xf32>
    %c0_119 = arith.constant 0 : index
    %c0_120 = arith.constant 0 : index
    %246 = vector.load %arg5[%c0_119, %c0_120] : memref<64x128xf32, #tpu.memory_space<vmem>>, vector<64x128xf32>
    %cst_121 = arith.constant dense<0.000000e+00> : vector<8x128xf32>
    %247 = tpu.matmul %245, %246, %cst_121 {dimension_numbers = #tpu.dot_dimension_numbers<[1], [0], [0], [1], [0, 0, 1, 1], [], []>} : vector<8x64xf32>, vector<64x128xf32>, vector<8x128xf32> -> vector<8x128xf32>
    %c0_122 = arith.constant 0 : index
    %c0_123 = arith.constant 0 : index
    %248 = vector.load %arg6[%c0_122, %c0_123] : memref<1x128xf32, #tpu.memory_space<vmem>>, vector<1x128xf32>
    %249 = vector.broadcast %248 : vector<1x128xf32> to vector<8x128xf32>
    %250 = arith.addf %247, %249 : vector<8x128xf32>
    %251 = arith.negf %250 : vector<8x128xf32>
    %252 = math.exp %251 : vector<8x128xf32>
    %cst_124 = arith.constant 1.000000e+00 : f32
    %253 = vector.broadcast %cst_124 : f32 to vector<8x128xf32>
    %254 = arith.addf %253, %252 : vector<8x128xf32>
    %255 = arith.divf %253, %254 : vector<8x128xf32>
    %256 = math.tanh %250 : vector<8x128xf32>
    %257 = vector.extract_strided_slice %255 {offsets = [0, 0], sizes = [8, 32], strides = [1, 1]} : vector<8x128xf32> to vector<8x32xf32>
    %258 = vector.extract_strided_slice %255 {offsets = [0, 32], sizes = [8, 32], strides = [1, 1]} : vector<8x128xf32> to vector<8x32xf32>
    %259 = vector.extract_strided_slice %256 {offsets = [0, 64], sizes = [8, 32], strides = [1, 1]} : vector<8x128xf32> to vector<8x32xf32>
    %260 = vector.extract_strided_slice %255 {offsets = [0, 96], sizes = [8, 32], strides = [1, 1]} : vector<8x128xf32> to vector<8x32xf32>
    %261 = arith.mulf %258, %212 : vector<8x32xf32>
    %262 = arith.mulf %257, %259 : vector<8x32xf32>
    %263 = arith.addf %261, %262 : vector<8x32xf32>
    %264 = math.tanh %263 : vector<8x32xf32>
    %265 = arith.mulf %260, %264 : vector<8x32xf32>
    %c0_125 = arith.constant 0 : index
    %c0_126 = arith.constant 0 : index
    %266 = vector.load %arg9[%c0_125, %c0_126] : memref<32x128xf32, #tpu.memory_space<vmem>>, vector<32x128xf32>
    %cst_127 = arith.constant dense<0.000000e+00> : vector<8x128xf32>
    %267 = tpu.matmul %265, %266, %cst_127 {dimension_numbers = #tpu.dot_dimension_numbers<[1], [0], [0], [1], [0, 0, 1, 1], [], []>} : vector<8x32xf32>, vector<32x128xf32>, vector<8x128xf32> -> vector<8x128xf32>
    %c0_128 = arith.constant 0 : index
    %c0_129 = arith.constant 0 : index
    %268 = vector.load %arg10[%c0_128, %c0_129] : memref<1x128xf32, #tpu.memory_space<vmem>>, vector<1x128xf32>
    %269 = vector.broadcast %268 : vector<1x128xf32> to vector<8x128xf32>
    %270 = arith.addf %267, %269 : vector<8x128xf32>
    %c0_130 = arith.constant 0 : index
    %c0_131 = arith.constant 0 : index
    %271 = vector.load %arg11[%c0_130, %c0_131] : memref<128x128xf32, #tpu.memory_space<vmem>>, vector<128x128xf32>
    %cst_132 = arith.constant dense<0.000000e+00> : vector<8x128xf32>
    %272 = tpu.matmul %270, %271, %cst_132 {dimension_numbers = #tpu.dot_dimension_numbers<[1], [0], [0], [1], [0, 0, 1, 1], [], []>} : vector<8x128xf32>, vector<128x128xf32>, vector<8x128xf32> -> vector<8x128xf32>
    %c0_133 = arith.constant 0 : index
    %c0_134 = arith.constant 0 : index
    %273 = vector.load %arg12[%c0_133, %c0_134] : memref<1x128xf32, #tpu.memory_space<vmem>>, vector<1x128xf32>
    %274 = vector.broadcast %273 : vector<1x128xf32> to vector<8x128xf32>
    %275 = arith.addf %272, %274 : vector<8x128xf32>
    %c32_135 = arith.constant 32 : index
    %c0_136 = arith.constant 0 : index
    %276 = vector.load %arg13[%c32_135, %c0_136] : memref<64x128xf32, #tpu.memory_space<vmem>>, vector<8x128xf32>
    tpu.vector_store %arg13[%c32_135, %c0_136], %275 {strides = array<i32>} : memref<64x128xf32, #tpu.memory_space<vmem>>, vector<8x128xf32>,
    %c40 = arith.constant 40 : index
    %c0_137 = arith.constant 0 : index
    %277 = vector.load %arg15[%c40, %c0_137] : memref<64x128xf32, #tpu.memory_space<vmem>>, vector<8x128xf32>
    %c0_138 = arith.constant 0 : index
    %c0_139 = arith.constant 0 : index
    %278 = vector.load %arg3[%c0_138, %c0_139] : memref<32x128xf32, #tpu.memory_space<vmem>>, vector<32x128xf32>
    %cst_140 = arith.constant dense<0.000000e+00> : vector<8x128xf32>
    %279 = tpu.matmul %244, %278, %cst_140 {dimension_numbers = #tpu.dot_dimension_numbers<[1], [0], [0], [1], [0, 0, 1, 1], [], []>} : vector<8x32xf32>, vector<32x128xf32>, vector<8x128xf32> -> vector<8x128xf32>
    %280 = arith.addf %277, %279 : vector<8x128xf32>
    %281 = arith.negf %280 : vector<8x128xf32>
    %282 = math.exp %281 : vector<8x128xf32>
    %cst_141 = arith.constant 1.000000e+00 : f32
    %283 = vector.broadcast %cst_141 : f32 to vector<8x128xf32>
    %284 = arith.addf %283, %282 : vector<8x128xf32>
    %285 = arith.divf %283, %284 : vector<8x128xf32>
    %286 = math.tanh %280 : vector<8x128xf32>
    %287 = vector.extract_strided_slice %285 {offsets = [0, 0], sizes = [8, 32], strides = [1, 1]} : vector<8x128xf32> to vector<8x32xf32>
    %288 = vector.extract_strided_slice %285 {offsets = [0, 32], sizes = [8, 32], strides = [1, 1]} : vector<8x128xf32> to vector<8x32xf32>
    %289 = vector.extract_strided_slice %286 {offsets = [0, 64], sizes = [8, 32], strides = [1, 1]} : vector<8x128xf32> to vector<8x32xf32>
    %290 = vector.extract_strided_slice %285 {offsets = [0, 96], sizes = [8, 32], strides = [1, 1]} : vector<8x128xf32> to vector<8x32xf32>
    %291 = arith.mulf %288, %242 : vector<8x32xf32>
    %292 = arith.mulf %287, %289 : vector<8x32xf32>
    %293 = arith.addf %291, %292 : vector<8x32xf32>
    %294 = math.tanh %293 : vector<8x32xf32>
    %295 = arith.mulf %290, %294 : vector<8x32xf32>
    %296 = tpu.concatenate %295, %265 in 1 : vector<8x32xf32>, vector<8x32xf32> -> vector<8x64xf32>
    %c0_142 = arith.constant 0 : index
    %c0_143 = arith.constant 0 : index
    %297 = vector.load %arg5[%c0_142, %c0_143] : memref<64x128xf32, #tpu.memory_space<vmem>>, vector<64x128xf32>
    %cst_144 = arith.constant dense<0.000000e+00> : vector<8x128xf32>
    %298 = tpu.matmul %296, %297, %cst_144 {dimension_numbers = #tpu.dot_dimension_numbers<[1], [0], [0], [1], [0, 0, 1, 1], [], []>} : vector<8x64xf32>, vector<64x128xf32>, vector<8x128xf32> -> vector<8x128xf32>
    %c0_145 = arith.constant 0 : index
    %c0_146 = arith.constant 0 : index
    %299 = vector.load %arg6[%c0_145, %c0_146] : memref<1x128xf32, #tpu.memory_space<vmem>>, vector<1x128xf32>
    %300 = vector.broadcast %299 : vector<1x128xf32> to vector<8x128xf32>
    %301 = arith.addf %298, %300 : vector<8x128xf32>
    %302 = arith.negf %301 : vector<8x128xf32>
    %303 = math.exp %302 : vector<8x128xf32>
    %cst_147 = arith.constant 1.000000e+00 : f32
    %304 = vector.broadcast %cst_147 : f32 to vector<8x128xf32>
    %305 = arith.addf %304, %303 : vector<8x128xf32>
    %306 = arith.divf %304, %305 : vector<8x128xf32>
    %307 = math.tanh %301 : vector<8x128xf32>
    %308 = vector.extract_strided_slice %306 {offsets = [0, 0], sizes = [8, 32], strides = [1, 1]} : vector<8x128xf32> to vector<8x32xf32>
    %309 = vector.extract_strided_slice %306 {offsets = [0, 32], sizes = [8, 32], strides = [1, 1]} : vector<8x128xf32> to vector<8x32xf32>
    %310 = vector.extract_strided_slice %307 {offsets = [0, 64], sizes = [8, 32], strides = [1, 1]} : vector<8x128xf32> to vector<8x32xf32>
    %311 = vector.extract_strided_slice %306 {offsets = [0, 96], sizes = [8, 32], strides = [1, 1]} : vector<8x128xf32> to vector<8x32xf32>
    %312 = arith.mulf %309, %263 : vector<8x32xf32>
    %313 = arith.mulf %308, %310 : vector<8x32xf32>
    %314 = arith.addf %312, %313 : vector<8x32xf32>
    %315 = math.tanh %314 : vector<8x32xf32>
    %316 = arith.mulf %311, %315 : vector<8x32xf32>
    %c0_148 = arith.constant 0 : index
    %c0_149 = arith.constant 0 : index
    %317 = vector.load %arg9[%c0_148, %c0_149] : memref<32x128xf32, #tpu.memory_space<vmem>>, vector<32x128xf32>
    %cst_150 = arith.constant dense<0.000000e+00> : vector<8x128xf32>
    %318 = tpu.matmul %316, %317, %cst_150 {dimension_numbers = #tpu.dot_dimension_numbers<[1], [0], [0], [1], [0, 0, 1, 1], [], []>} : vector<8x32xf32>, vector<32x128xf32>, vector<8x128xf32> -> vector<8x128xf32>
    %c0_151 = arith.constant 0 : index
    %c0_152 = arith.constant 0 : index
    %319 = vector.load %arg10[%c0_151, %c0_152] : memref<1x128xf32, #tpu.memory_space<vmem>>, vector<1x128xf32>
    %320 = vector.broadcast %319 : vector<1x128xf32> to vector<8x128xf32>
    %321 = arith.addf %318, %320 : vector<8x128xf32>
    %c0_153 = arith.constant 0 : index
    %c0_154 = arith.constant 0 : index
    %322 = vector.load %arg11[%c0_153, %c0_154] : memref<128x128xf32, #tpu.memory_space<vmem>>, vector<128x128xf32>
    %cst_155 = arith.constant dense<0.000000e+00> : vector<8x128xf32>
    %323 = tpu.matmul %321, %322, %cst_155 {dimension_numbers = #tpu.dot_dimension_numbers<[1], [0], [0], [1], [0, 0, 1, 1], [], []>} : vector<8x128xf32>, vector<128x128xf32>, vector<8x128xf32> -> vector<8x128xf32>
    %c0_156 = arith.constant 0 : index
    %c0_157 = arith.constant 0 : index
    %324 = vector.load %arg12[%c0_156, %c0_157] : memref<1x128xf32, #tpu.memory_space<vmem>>, vector<1x128xf32>
    %325 = vector.broadcast %324 : vector<1x128xf32> to vector<8x128xf32>
    %326 = arith.addf %323, %325 : vector<8x128xf32>
    %c40_158 = arith.constant 40 : index
    %c0_159 = arith.constant 0 : index
    %327 = vector.load %arg13[%c40_158, %c0_159] : memref<64x128xf32, #tpu.memory_space<vmem>>, vector<8x128xf32>
    tpu.vector_store %arg13[%c40_158, %c0_159], %326 {strides = array<i32>} : memref<64x128xf32, #tpu.memory_space<vmem>>, vector<8x128xf32>,
    %c48 = arith.constant 48 : index
    %c0_160 = arith.constant 0 : index
    %328 = vector.load %arg15[%c48, %c0_160] : memref<64x128xf32, #tpu.memory_space<vmem>>, vector<8x128xf32>
    %c0_161 = arith.constant 0 : index
    %c0_162 = arith.constant 0 : index
    %329 = vector.load %arg3[%c0_161, %c0_162] : memref<32x128xf32, #tpu.memory_space<vmem>>, vector<32x128xf32>
    %cst_163 = arith.constant dense<0.000000e+00> : vector<8x128xf32>
    %330 = tpu.matmul %295, %329, %cst_163 {dimension_numbers = #tpu.dot_dimension_numbers<[1], [0], [0], [1], [0, 0, 1, 1], [], []>} : vector<8x32xf32>, vector<32x128xf32>, vector<8x128xf32> -> vector<8x128xf32>
    %331 = arith.addf %328, %330 : vector<8x128xf32>
    %332 = arith.negf %331 : vector<8x128xf32>
    %333 = math.exp %332 : vector<8x128xf32>
    %cst_164 = arith.constant 1.000000e+00 : f32
    %334 = vector.broadcast %cst_164 : f32 to vector<8x128xf32>
    %335 = arith.addf %334, %333 : vector<8x128xf32>
    %336 = arith.divf %334, %335 : vector<8x128xf32>
    %337 = math.tanh %331 : vector<8x128xf32>
    %338 = vector.extract_strided_slice %336 {offsets = [0, 0], sizes = [8, 32], strides = [1, 1]} : vector<8x128xf32> to vector<8x32xf32>
    %339 = vector.extract_strided_slice %336 {offsets = [0, 32], sizes = [8, 32], strides = [1, 1]} : vector<8x128xf32> to vector<8x32xf32>
    %340 = vector.extract_strided_slice %337 {offsets = [0, 64], sizes = [8, 32], strides = [1, 1]} : vector<8x128xf32> to vector<8x32xf32>
    %341 = vector.extract_strided_slice %336 {offsets = [0, 96], sizes = [8, 32], strides = [1, 1]} : vector<8x128xf32> to vector<8x32xf32>
    %342 = arith.mulf %339, %293 : vector<8x32xf32>
    %343 = arith.mulf %338, %340 : vector<8x32xf32>
    %344 = arith.addf %342, %343 : vector<8x32xf32>
    %345 = math.tanh %344 : vector<8x32xf32>
    %346 = arith.mulf %341, %345 : vector<8x32xf32>
    %347 = tpu.concatenate %346, %316 in 1 : vector<8x32xf32>, vector<8x32xf32> -> vector<8x64xf32>
    %c0_165 = arith.constant 0 : index
    %c0_166 = arith.constant 0 : index
    %348 = vector.load %arg5[%c0_165, %c0_166] : memref<64x128xf32, #tpu.memory_space<vmem>>, vector<64x128xf32>
    %cst_167 = arith.constant dense<0.000000e+00> : vector<8x128xf32>
    %349 = tpu.matmul %347, %348, %cst_167 {dimension_numbers = #tpu.dot_dimension_numbers<[1], [0], [0], [1], [0, 0, 1, 1], [], []>} : vector<8x64xf32>, vector<64x128xf32>, vector<8x128xf32> -> vector<8x128xf32>
    %c0_168 = arith.constant 0 : index
    %c0_169 = arith.constant 0 : index
    %350 = vector.load %arg6[%c0_168, %c0_169] : memref<1x128xf32, #tpu.memory_space<vmem>>, vector<1x128xf32>
    %351 = vector.broadcast %350 : vector<1x128xf32> to vector<8x128xf32>
    %352 = arith.addf %349, %351 : vector<8x128xf32>
    %353 = arith.negf %352 : vector<8x128xf32>
    %354 = math.exp %353 : vector<8x128xf32>
    %cst_170 = arith.constant 1.000000e+00 : f32
    %355 = vector.broadcast %cst_170 : f32 to vector<8x128xf32>
    %356 = arith.addf %355, %354 : vector<8x128xf32>
    %357 = arith.divf %355, %356 : vector<8x128xf32>
    %358 = math.tanh %352 : vector<8x128xf32>
    %359 = vector.extract_strided_slice %357 {offsets = [0, 0], sizes = [8, 32], strides = [1, 1]} : vector<8x128xf32> to vector<8x32xf32>
    %360 = vector.extract_strided_slice %357 {offsets = [0, 32], sizes = [8, 32], strides = [1, 1]} : vector<8x128xf32> to vector<8x32xf32>
    %361 = vector.extract_strided_slice %358 {offsets = [0, 64], sizes = [8, 32], strides = [1, 1]} : vector<8x128xf32> to vector<8x32xf32>
    %362 = vector.extract_strided_slice %357 {offsets = [0, 96], sizes = [8, 32], strides = [1, 1]} : vector<8x128xf32> to vector<8x32xf32>
    %363 = arith.mulf %360, %314 : vector<8x32xf32>
    %364 = arith.mulf %359, %361 : vector<8x32xf32>
    %365 = arith.addf %363, %364 : vector<8x32xf32>
    %366 = math.tanh %365 : vector<8x32xf32>
    %367 = arith.mulf %362, %366 : vector<8x32xf32>
    %c0_171 = arith.constant 0 : index
    %c0_172 = arith.constant 0 : index
    %368 = vector.load %arg9[%c0_171, %c0_172] : memref<32x128xf32, #tpu.memory_space<vmem>>, vector<32x128xf32>
    %cst_173 = arith.constant dense<0.000000e+00> : vector<8x128xf32>
    %369 = tpu.matmul %367, %368, %cst_173 {dimension_numbers = #tpu.dot_dimension_numbers<[1], [0], [0], [1], [0, 0, 1, 1], [], []>} : vector<8x32xf32>, vector<32x128xf32>, vector<8x128xf32> -> vector<8x128xf32>
    %c0_174 = arith.constant 0 : index
    %c0_175 = arith.constant 0 : index
    %370 = vector.load %arg10[%c0_174, %c0_175] : memref<1x128xf32, #tpu.memory_space<vmem>>, vector<1x128xf32>
    %371 = vector.broadcast %370 : vector<1x128xf32> to vector<8x128xf32>
    %372 = arith.addf %369, %371 : vector<8x128xf32>
    %c0_176 = arith.constant 0 : index
    %c0_177 = arith.constant 0 : index
    %373 = vector.load %arg11[%c0_176, %c0_177] : memref<128x128xf32, #tpu.memory_space<vmem>>, vector<128x128xf32>
    %cst_178 = arith.constant dense<0.000000e+00> : vector<8x128xf32>
    %374 = tpu.matmul %372, %373, %cst_178 {dimension_numbers = #tpu.dot_dimension_numbers<[1], [0], [0], [1], [0, 0, 1, 1], [], []>} : vector<8x128xf32>, vector<128x128xf32>, vector<8x128xf32> -> vector<8x128xf32>
    %c0_179 = arith.constant 0 : index
    %c0_180 = arith.constant 0 : index
    %375 = vector.load %arg12[%c0_179, %c0_180] : memref<1x128xf32, #tpu.memory_space<vmem>>, vector<1x128xf32>
    %376 = vector.broadcast %375 : vector<1x128xf32> to vector<8x128xf32>
    %377 = arith.addf %374, %376 : vector<8x128xf32>
    %c48_181 = arith.constant 48 : index
    %c0_182 = arith.constant 0 : index
    %378 = vector.load %arg13[%c48_181, %c0_182] : memref<64x128xf32, #tpu.memory_space<vmem>>, vector<8x128xf32>
    tpu.vector_store %arg13[%c48_181, %c0_182], %377 {strides = array<i32>} : memref<64x128xf32, #tpu.memory_space<vmem>>, vector<8x128xf32>,
    %c56 = arith.constant 56 : index
    %c0_183 = arith.constant 0 : index
    %379 = vector.load %arg15[%c56, %c0_183] : memref<64x128xf32, #tpu.memory_space<vmem>>, vector<8x128xf32>
    %c0_184 = arith.constant 0 : index
    %c0_185 = arith.constant 0 : index
    %380 = vector.load %arg3[%c0_184, %c0_185] : memref<32x128xf32, #tpu.memory_space<vmem>>, vector<32x128xf32>
    %cst_186 = arith.constant dense<0.000000e+00> : vector<8x128xf32>
    %381 = tpu.matmul %346, %380, %cst_186 {dimension_numbers = #tpu.dot_dimension_numbers<[1], [0], [0], [1], [0, 0, 1, 1], [], []>} : vector<8x32xf32>, vector<32x128xf32>, vector<8x128xf32> -> vector<8x128xf32>
    %382 = arith.addf %379, %381 : vector<8x128xf32>
    %383 = arith.negf %382 : vector<8x128xf32>
    %384 = math.exp %383 : vector<8x128xf32>
    %cst_187 = arith.constant 1.000000e+00 : f32
    %385 = vector.broadcast %cst_187 : f32 to vector<8x128xf32>
    %386 = arith.addf %385, %384 : vector<8x128xf32>
    %387 = arith.divf %385, %386 : vector<8x128xf32>
    %388 = math.tanh %382 : vector<8x128xf32>
    %389 = vector.extract_strided_slice %387 {offsets = [0, 0], sizes = [8, 32], strides = [1, 1]} : vector<8x128xf32> to vector<8x32xf32>
    %390 = vector.extract_strided_slice %387 {offsets = [0, 32], sizes = [8, 32], strides = [1, 1]} : vector<8x128xf32> to vector<8x32xf32>
    %391 = vector.extract_strided_slice %388 {offsets = [0, 64], sizes = [8, 32], strides = [1, 1]} : vector<8x128xf32> to vector<8x32xf32>
    %392 = vector.extract_strided_slice %387 {offsets = [0, 96], sizes = [8, 32], strides = [1, 1]} : vector<8x128xf32> to vector<8x32xf32>
    %393 = arith.mulf %390, %344 : vector<8x32xf32>
    %394 = arith.mulf %389, %391 : vector<8x32xf32>
    %395 = arith.addf %393, %394 : vector<8x32xf32>
    %396 = math.tanh %395 : vector<8x32xf32>
    %397 = arith.mulf %392, %396 : vector<8x32xf32>
    %398 = tpu.concatenate %397, %367 in 1 : vector<8x32xf32>, vector<8x32xf32> -> vector<8x64xf32>
    %c0_188 = arith.constant 0 : index
    %c0_189 = arith.constant 0 : index
    %399 = vector.load %arg5[%c0_188, %c0_189] : memref<64x128xf32, #tpu.memory_space<vmem>>, vector<64x128xf32>
    %cst_190 = arith.constant dense<0.000000e+00> : vector<8x128xf32>
    %400 = tpu.matmul %398, %399, %cst_190 {dimension_numbers = #tpu.dot_dimension_numbers<[1], [0], [0], [1], [0, 0, 1, 1], [], []>} : vector<8x64xf32>, vector<64x128xf32>, vector<8x128xf32> -> vector<8x128xf32>
    %c0_191 = arith.constant 0 : index
    %c0_192 = arith.constant 0 : index
    %401 = vector.load %arg6[%c0_191, %c0_192] : memref<1x128xf32, #tpu.memory_space<vmem>>, vector<1x128xf32>
    %402 = vector.broadcast %401 : vector<1x128xf32> to vector<8x128xf32>
    %403 = arith.addf %400, %402 : vector<8x128xf32>
    %404 = arith.negf %403 : vector<8x128xf32>
    %405 = math.exp %404 : vector<8x128xf32>
    %cst_193 = arith.constant 1.000000e+00 : f32
    %406 = vector.broadcast %cst_193 : f32 to vector<8x128xf32>
    %407 = arith.addf %406, %405 : vector<8x128xf32>
    %408 = arith.divf %406, %407 : vector<8x128xf32>
    %409 = math.tanh %403 : vector<8x128xf32>
    %410 = vector.extract_strided_slice %408 {offsets = [0, 0], sizes = [8, 32], strides = [1, 1]} : vector<8x128xf32> to vector<8x32xf32>
    %411 = vector.extract_strided_slice %408 {offsets = [0, 32], sizes = [8, 32], strides = [1, 1]} : vector<8x128xf32> to vector<8x32xf32>
    %412 = vector.extract_strided_slice %409 {offsets = [0, 64], sizes = [8, 32], strides = [1, 1]} : vector<8x128xf32> to vector<8x32xf32>
    %413 = vector.extract_strided_slice %408 {offsets = [0, 96], sizes = [8, 32], strides = [1, 1]} : vector<8x128xf32> to vector<8x32xf32>
    %414 = arith.mulf %411, %365 : vector<8x32xf32>
    %415 = arith.mulf %410, %412 : vector<8x32xf32>
    %416 = arith.addf %414, %415 : vector<8x32xf32>
    %417 = math.tanh %416 : vector<8x32xf32>
    %418 = arith.mulf %413, %417 : vector<8x32xf32>
    %c0_194 = arith.constant 0 : index
    %c0_195 = arith.constant 0 : index
    %419 = vector.load %arg9[%c0_194, %c0_195] : memref<32x128xf32, #tpu.memory_space<vmem>>, vector<32x128xf32>
    %cst_196 = arith.constant dense<0.000000e+00> : vector<8x128xf32>
    %420 = tpu.matmul %418, %419, %cst_196 {dimension_numbers = #tpu.dot_dimension_numbers<[1], [0], [0], [1], [0, 0, 1, 1], [], []>} : vector<8x32xf32>, vector<32x128xf32>, vector<8x128xf32> -> vector<8x128xf32>
    %c0_197 = arith.constant 0 : index
    %c0_198 = arith.constant 0 : index
    %421 = vector.load %arg10[%c0_197, %c0_198] : memref<1x128xf32, #tpu.memory_space<vmem>>, vector<1x128xf32>
    %422 = vector.broadcast %421 : vector<1x128xf32> to vector<8x128xf32>
    %423 = arith.addf %420, %422 : vector<8x128xf32>
    %c0_199 = arith.constant 0 : index
    %c0_200 = arith.constant 0 : index
    %424 = vector.load %arg11[%c0_199, %c0_200] : memref<128x128xf32, #tpu.memory_space<vmem>>, vector<128x128xf32>
    %cst_201 = arith.constant dense<0.000000e+00> : vector<8x128xf32>
    %425 = tpu.matmul %423, %424, %cst_201 {dimension_numbers = #tpu.dot_dimension_numbers<[1], [0], [0], [1], [0, 0, 1, 1], [], []>} : vector<8x128xf32>, vector<128x128xf32>, vector<8x128xf32> -> vector<8x128xf32>
    %c0_202 = arith.constant 0 : index
    %c0_203 = arith.constant 0 : index
    %426 = vector.load %arg12[%c0_202, %c0_203] : memref<1x128xf32, #tpu.memory_space<vmem>>, vector<1x128xf32>
    %427 = vector.broadcast %426 : vector<1x128xf32> to vector<8x128xf32>
    %428 = arith.addf %425, %427 : vector<8x128xf32>
    %c56_204 = arith.constant 56 : index
    %c0_205 = arith.constant 0 : index
    %429 = vector.load %arg13[%c56_204, %c0_205] : memref<64x128xf32, #tpu.memory_space<vmem>>, vector<8x128xf32>
    tpu.vector_store %arg13[%c56_204, %c0_205], %428 {strides = array<i32>} : memref<64x128xf32, #tpu.memory_space<vmem>>, vector<8x128xf32>,
    %430 = tpu.concatenate %397, %395, %418, %416 in 1 : vector<8x32xf32>, vector<8x32xf32>, vector<8x32xf32>, vector<8x32xf32> -> vector<8x128xf32>
    %c0_206 = arith.constant 0 : index
    %c0_207 = arith.constant 0 : index
    %431 = vector.load %arg14[%c0_206, %c0_207] : memref<8x128xf32, #tpu.memory_space<vmem>>, vector<8x128xf32>
    tpu.vector_store %arg14[%c0_206, %c0_207], %430 {strides = array<i32>} : memref<8x128xf32, #tpu.memory_space<vmem>>, vector<8x128xf32>,
    return
  }
}

</mosaic_0001>

<bundles_post_ra>
// kernel: forward.1
= control target key start
LH: loop header
LB: loop body
LE: loop exit
PB: predicated region body
PF: predicated region fallthrough
CT: control target
= control target key end

     0   :  { %20 = vsyncpa [#allocation4], 0  ;;  %s6476_s0 = inlined_call_operand.vmem [shape: s32[64,1], index: 0, kind: input, shape index: {}]   ;;  %s6477_s1 = inlined_call_operand.vmem [shape: f32[128,32], index: 1, kind: input, shape index: {}]   ;;  %s6478_s2 = inlined_call_operand.vmem [shape: f32[32,128], index: 2, kind: input, shape index: {}]   ;;  %s6479_s3 = inlined_call_operand.vmem [shape: f32[32,128], index: 3, kind: input, shape index: {}]   ;;  %s6480_s4 = inlined_call_operand.vmem [shape: f32[1,128], index: 4, kind: input, shape index: {}]   ;;  %s6481_s5 = inlined_call_operand.vmem [shape: f32[64,128], index: 5, kind: input, shape index: {}]   ;;  %s6482_s6 = inlined_call_operand.hbm [shape: f32[1,128], index: 6, kind: input, shape index: {}]   ;;  %s6483_s7 = inlined_call_operand.vmem [shape: f32[2,8,32], index: 7, kind: input, shape index: {}]   ;;  %s6484_s8 = inlined_call_operand.vmem [shape: f32[2,8,32], index: 8, kind: input, shape index: {}]   ;;  %s6485_s9 = inlined_call_operand.vmem [shape: f32[32,128], index: 9, kind: input, shape index: {}]   ;;  %s6486_s10 = inlined_call_operand.hbm [shape: f32[1,128], index: 10, kind: input, shape index: {}]   ;;  %s6487_s11 = inlined_call_operand.vmem [shape: f32[128,128], index: 11, kind: input, shape index: {}]   ;;  %s6488_s12 = inlined_call_operand.hbm [shape: f32[1,128], index: 12, kind: input, shape index: {}]   ;;  %s6489_s13 = inlined_call_operand.vmem [shape: f32[64,128], index: 13, kind: output, shape index: {0}]   ;;  %s6490_s14 = inlined_call_operand.vmem [shape: f32[8,128], index: 14, kind: output, shape index: {1}]  }
   0x1   :  { %21 = vsyncpa [#allocation6], 0  ;;  %s5386_s29 = smov [#allocation5]   ;;  %s5387_s15 = smov [#allocation3]  }
   0x2   :  { %s56_s30 = sshll.u32 %s5386_s29, 4  ;;  %s40_s16 = sshll.u32 %s5387_s15, 4  ;;  %s57_s30 = int_to_ptr.vmem [resolvable:$true] %s56_s30  ;;  %s41_s16 = int_to_ptr.vmem [resolvable:$true] %s40_s16 }
   0x3   :  { %s5316_s19 = scalar_lea.hbm %s6486_s10, 16 }
   0x4   :  { %p5317_p0 = scmp.ne.s32.totalorder %s6486_s10, %s5316_s19  ;;  %p5320_p1 = scmp.lt.u32.totalorder %s5316_s19, %s6486_s10 }
   0x6   :  { %p5322_p2 = pnand %p5320_p1, %p5317_p0 }
   0x8   :  { %5325 = shalt.err (!%p5322_p2)
}
   0x9   :  { %s5326_s24 = scalar_lea.vmem %s57_s30, 16  ;;  %s5330_s25 = scalar_lea.vmem %s57_s30, 32 }
   0xa   :  { %p5327_p3 = scmp.ne.s32.totalorder %s57_s30, %s5326_s24  ;;  %p5331_p4 = scmp.lt.s32.totalorder %s57_s30, %s57_s30 }
   0xb   :  { %p5332_p5 = scmp.lt.s32.totalorder %s5330_s25, %s5326_s24 }
   0xd   :  { %p5333_p6 = por %p5332_p5, %p5331_p4 }
   0xf   :  { %p5334_p7 = pnand %p5333_p6, %p5327_p3 }
  0x11   :  { %5337 = shalt.err (!%p5334_p7)
}
  0x12   :  { %59 = dma.hbm_to_vmem [thread:$0]  %s6486_s10, 16, %s57_s30, [#allocation6]  }
  0x13   :  { %s5338_s15 = scalar_lea.hbm %s6482_s6, 16 }
  0x14   :  { %p5339_p8 = scmp.ne.s32.totalorder %s6482_s6, %s5338_s15  ;;  %p5342_p9 = scmp.lt.u32.totalorder %s5338_s15, %s6482_s6 }
  0x16   :  { %p5344_p10 = pnand %p5342_p9, %p5339_p8 }
  0x18   :  { %5347 = shalt.err (!%p5344_p10)
}
  0x19   :  { %s5348_s21 = scalar_lea.vmem %s41_s16, 16  ;;  %s5352_s22 = scalar_lea.vmem %s41_s16, 32 }
  0x1a   :  { %p5349_p11 = scmp.ne.s32.totalorder %s41_s16, %s5348_s21  ;;  %p5353_p12 = scmp.lt.s32.totalorder %s41_s16, %s41_s16 }
  0x1b   :  { %p5354_p13 = scmp.lt.s32.totalorder %s5352_s22, %s5348_s21 }
  0x1d   :  { %p5355_p0 = por %p5354_p13, %p5353_p12 }
  0x1f   :  { %p5356_p1 = pnand %p5355_p0, %p5349_p11 }
  0x21   :  { %5359 = shalt.err (!%p5356_p1)
}
  0x22   :  { %43 = dma.hbm_to_vmem [thread:$0]  %s6482_s6, 16, %s41_s16, [#allocation4]  }
  0x23   :  { %s5388_s23 = smov [#allocation7]   ;;  %s5360_s27 = scalar_lea.hbm %s6488_s12, 16 }
  0x24   :  { %s68_s24 = sshll.u32 %s5388_s23, 4  ;;  %p5361_p2 = scmp.ne.s32.totalorder %s6488_s12, %s5360_s27  ;;  %s69_s24 = int_to_ptr.vmem [resolvable:$true] %s68_s24 }
  0x25   :  { %p5364_p3 = scmp.lt.u32.totalorder %s5360_s27, %s6488_s12 }
  0x27   :  { %p5366_p4 = pnand %p5364_p3, %p5361_p2 }
  0x29   :  { %5369 = shalt.err (!%p5366_p4)
}
  0x2a   :  { %s5370_s18 = scalar_lea.vmem %s69_s24, 16  ;;  %s5374_s6 = scalar_lea.vmem %s69_s24, 32 }
  0x2b   :  { %p5371_p5 = scmp.ne.s32.totalorder %s69_s24, %s5370_s18  ;;  %p5375_p6 = scmp.lt.s32.totalorder %s69_s24, %s69_s24 }
  0x2c   :  { %p5376_p7 = scmp.lt.s32.totalorder %s5374_s6, %s5370_s18 }
  0x2e   :  { %p5377_p8 = por %p5376_p7, %p5375_p6 }
  0x30   :  { %p5378_p9 = pnand %p5377_p8, %p5371_p5 }
  0x32   :  { %5381 = shalt.err (!%p5378_p9)
}
  0x33   :  { %71 = dma.hbm_to_vmem [thread:$0]  %s6488_s12, 16, %s69_s24, [#allocation6]  }
  0x34   :  { %5382 = dma.done.wait [#allocation4], 16  }
  0x35   :  { %5383 = vsyncadd [#allocation4], 4294967280 }
  0x36   :  { %5384 = dma.done.wait [#allocation6], 32  }
  0x37   :  { %5385 = vsyncadd [#allocation6], 4294967264  ;;  %v5389_v0 = vmov 0   ;;  %v81_v1 = vld [vmem:[%s6476_s0] sm:$0xff]  ;;  %v83_v2 = vld [vmem:[%s6476_s0 + $0x10] sm:$0xff]  ;;  %v5390_v39 = vmov 0.0|0.0   ;;  %v89_v40 = vlaneseq }
  0x38   :  { %5186 = vset.pattern.permute.xlu0 %v5389_v0  ;;  %5187 = vset.pattern.permute.xlu1 %v5389_v0  ;;  %v82_v3 = vld [vmem:[%s6476_s0 + $0x8] sm:$0xff]  ;;  %v84_v4 = vld [vmem:[%s6476_s0 + $0x18] sm:$0xff]  ;;  %v139_v5 = vld [vmem:[%s6477_s1] sm:$0xff]  ;;  %v5391_v46 = vmov 1.0   ;;  %vm271_vm8 = vcmask 261120   ;;  %vm5392_vm9 = vmmov 0  }
  0x39   :  { %92 = vperm.xlu0 %5186, %v81_v1   ;;  %98 = vperm.xlu1 %5187, %v83_v2   ;;  %v140_v6 = vld [vmem:[%s6477_s1 + $0x8] sm:$0xff]  ;;  %v141_v8 = vld [vmem:[%s6477_s1 + $0x10] sm:$0xff]  ;;  %v142_v9 = vld [vmem:[%s6477_s1 + $0x18] sm:$0xff]  ;;  %v90_v41 = vand.u32 127, %v89_v40  ;;  %v5393_v59 = vmov 0.0   ;;  %s5394_s24 = smov 32  }
  0x3a   :  { %v4751_v7 = vpack.c.bf16 %v140_v6, %v139_v5  ;;  %v4755_v10 = vpack.c.bf16 %v142_v9, %v141_v8  ;;  %v143_v11 = vld [vmem:[%s6477_s1 + $0x20] sm:$0xff]  ;;  %v144_v12 = vld [vmem:[%s6477_s1 + $0x28] sm:$0xff]  ;;  %v145_v16 = vld [vmem:[%s6477_s1 + $0x30] sm:$0xff]  ;;  %vm546_vm10 = vcmask 523264   ;;  %s5396_s30 = smov 96   ;;  %vm3651_vm11 = vcmask 785408  }
  0x3b   :  { %v85_v13 = vld [vmem:[%s6476_s0 + $0x20] sm:$0xff]  ;;  %v86_v14 = vld [vmem:[%s6476_s0 + $0x28] sm:$0xff]  ;;  %v4759_v15 = vpack.c.bf16 %v144_v12, %v143_v11  ;;  %v146_v17 = vld [vmem:[%s6477_s1 + $0x38] sm:$0xff] }
  0x3c   :  { %4752 = vmatprep.subr.bf16.mxu0 %v4751_v7  ;;  %v87_v18 = vld [vmem:[%s6476_s0 + $0x30] sm:$0xff]  ;;  %v4763_v19 = vpack.c.bf16 %v146_v17, %v145_v16  ;;  %v147_v20 = vld [vmem:[%s6477_s1 + $0x40] sm:$0xff]  ;;  %v148_v21 = vld [vmem:[%s6477_s1 + $0x48] sm:$0xff] }
  0x3d   :  { %95 = vperm.xlu0 %5186, %v82_v3   ;;  %101 = vperm.xlu1 %5187, %v84_v4   ;;  %v88_v22 = vld [vmem:[%s6476_s0 + $0x38] sm:$0xff]  ;;  %v4767_v23 = vpack.c.bf16 %v148_v21, %v147_v20  ;;  %v149_v24 = vld [vmem:[%s6477_s1 + $0x50] sm:$0xff]  ;;  %v260_v26 = vld [vmem:[%s6478_s2] sm:$0xff] }
  0x3e   :  { %4754 = vmatpush3.bf16.msra.mxu0 %v4751_v7  ;;  %v150_v25 = vld [vmem:[%s6477_s1 + $0x58] sm:$0xff]  ;;  %v261_v27 = vld [vmem:[%s6478_s2 + $0x8] sm:$0xff]  ;;  %v262_v30 = vld [vmem:[%s6478_s2 + $0x10] sm:$0xff] }
  0x3f   :  { %4756 = vmatprep.subr.bf16.mxu0 %v4755_v10  ;;  %v4771_v28 = vpack.c.bf16 %v150_v25, %v149_v24  ;;  %v4783_v29 = vpack.c.bf16 %v261_v27, %v260_v26  ;;  %v263_v31 = vld [vmem:[%s6478_s2 + $0x18] sm:$0xff]  ;;  %v151_v32 = vld [vmem:[%s6477_s1 + $0x60] sm:$0xff]  ;;  %v152_v33 = vld [vmem:[%s6477_s1 + $0x68] sm:$0xff] }
  0x40   :  { %v4787_v34 = vpack.c.bf16 %v263_v31, %v262_v30  ;;  %v4775_v35 = vpack.c.bf16 %v152_v33, %v151_v32  ;;  %v153_v36 = vld [vmem:[%s6477_s1 + $0x70] sm:$0xff]  ;;  %v154_v37 = vld [vmem:[%s6477_s1 + $0x78] sm:$0xff]  ;;  %v416_v44 = vld [vmem:[%s6479_s3] sm:$0xff] }
  0x41   :  { %104 = vperm.xlu0 %5186, %v85_v13   ;;  %107 = vperm.xlu1 %5187, %v86_v14   ;;  %v4779_v38 = vpack.c.bf16 %v154_v37, %v153_v36  ;;  %v417_v45 = vld [vmem:[%s6479_s3 + $0x8] sm:$0xff]  ;;  %v418_v50 = vld [vmem:[%s6479_s3 + $0x10] sm:$0xff]  ;;  %v419_v51 = vld [vmem:[%s6479_s3 + $0x18] sm:$0xff] }
  0x42   :  { %4758 = vmatpush3.bf16.msra.mxu0 %v4755_v10  ;;  %4784 = vmatprep.subr.bf16.mxu1 %v4783_v29  ;;  %v5600_v47 = vpack.c.bf16 %v417_v45, %v416_v44  ;;  %v5609_v52 = vpack.c.bf16 %v419_v51, %v418_v50  ;;  %v409_v57 = vld [vmem:[%s6483_s7] sm:$0xff]  ;;  %v532_v36 = vld [vmem:[%s6481_s5 + $0x8] sm:$0xff]  ;;  %v533_v37 = vld [vmem:[%s6481_s5 + $0x10] sm:$0xff] }
  0x43   :  { %4760 = vmatprep.subr.bf16.mxu0 %v4759_v15  ;;  %4786 = vmatpush3.bf16.msra.mxu1 %v4783_v29  ;;  %v410_v58 = vld [vmem:[%s6484_s8] sm:$0xff]  ;;  %v534_v40 = vld [vmem:[%s6481_s5 + $0x18] sm:$0xff]  ;;  %v537_v45 = vld [vmem:[%s6481_s5 + $0x30] sm:$0xff] }
  0x44   :  { %4788 = vmatprep.subr.bf16.mxu1 %v4787_v34  ;;  %v3680_v6 = vld [vmem:[%s6480_s4] ss:$0 sm:$0xff]  ;;  %s5395_s4 = smov 64   ;;  %v3689_v50 = vld [vmem:[%s6483_s7 + $0x8] sm:$0xff] }
  0x45   :  { %110 = vperm.xlu0 %5186, %v87_v18   ;;  %113 = vperm.xlu1 %5187, %v88_v22   ;;  %v3690_v51 = vld [vmem:[%s6484_s8 + $0x8] sm:$0xff] }
  0x46   :  { %4762 = vmatpush3.bf16.msra.mxu0 %v4759_v15 }
  0x47   :  { %4764 = vmatprep.subr.bf16.mxu0 %v4763_v19  ;;  %4790 = vmatpush3.bf16.msra.mxu1 %v4787_v34 }
  0x48   :  { %4797 = vmatprep.subr.bf16.mxu1 %v5390_v39 }
  0x49   :  { %502 = vrot.lane.b32.xlu1 %v410_v58, %s5394_s24  ;;  %v5715_v58 = vld [vmem:[#allocation3] ss:$0 sm:$0xff] }
  0x4a   :  { %4766 = vmatpush3.bf16.msra.mxu0 %v4763_v19 }
  0x4b   :  { %4768 = vmatprep.subr.bf16.mxu0 %v4767_v23 }
  0x4e   :  { %4770 = vmatpush3.bf16.msra.mxu0 %v4767_v23 }
  0x4f   :  { %4772 = vmatprep.subr.bf16.mxu0 %v4771_v28 }
  0x52   :  { %4774 = vmatpush3.bf16.msra.mxu0 %v4771_v28 }
  0x53   :  { %4776 = vmatprep.subr.bf16.mxu0 %v4775_v35 }
  0x56   :  { %4778 = vmatpush3.bf16.msra.mxu0 %v4775_v35  ;;  %v531_v35 = vld [vmem:[%s6481_s5] sm:$0xff] }
  0x57   :  { %4780 = vmatprep.subr.bf16.mxu0 %v4779_v38 }
  0x5a   :  { %4782 = vmatpush3.bf16.msra.mxu0 %v4779_v38  ;;  %v5667_v38 = vpack.c.bf16 %v532_v36, %v531_v35  ;;  %v740_v36 = vld [vmem:[%s6487_s11 + $0x30] sm:$0xff] }
  0x5b   :  { %4791 = vmatprep.subr.bf16.mxu0 %v5390_v39 }
  0xb8   :  { %v93_v42 = vpop.permute.xlu0 %92  ;;  %v99_v43 = vpop.permute.xlu1 %98 }
  0xb9   :  { %vm115_vm0 = vcmp.eq.s32.totalorder %v90_v41, %v93_v42  ;;  %vm117_vm1 = vcmp.eq.s32.totalorder %v90_v41, %v99_v43  ;;  %v535_v42 = vld [vmem:[%s6481_s5 + $0x20] sm:$0xff]  ;;  %v536_v43 = vld [vmem:[%s6481_s5 + $0x28] sm:$0xff] }
  0xba   :  { %4111 = vmatprep.mubr.msk.f32.mxu0 %vm115_vm0, %v5391_v46  ;;  %v5683_v44 = vpack.c.bf16 %v536_v43, %v535_v42  ;;  %v742_v42 = vld [vmem:[%s6487_s11 + $0x40] sm:$0xff]  ;;  %v743_v43 = vld [vmem:[%s6487_s11 + $0x48] sm:$0xff] }
  0xbc   :  { %v96_v48 = vpop.permute.xlu0 %95  ;;  %v102_v49 = vpop.permute.xlu1 %101 }
  0xbd   :  { %vm116_vm2 = vcmp.eq.s32.totalorder %v90_v41, %v96_v48  ;;  %vm118_vm3 = vcmp.eq.s32.totalorder %v90_v41, %v102_v49 }
  0xbe   :  { %4112 = vmatmul.mubr.msk.f32.vlgmr.msra.gmra.mrb[0].mxu0 %vm116_vm2, %v5391_v46 }
  0xbf   :  { %4114 = vmatprep.mubr.msk.f32.mxu0 %vm117_vm1, %v5391_v46  ;;  %4793 = vmatpush3.bf16.msra.mxu0 %v5600_v47 }
  0xc0   :  { %v105_v53 = vpop.permute.xlu0 %104  ;;  %v108_v54 = vpop.permute.xlu1 %107  ;;  %4794 = vmatprep.subr.bf16.mxu0 %v5390_v39 }
  0xc1   :  { %vm119_vm4 = vcmp.eq.s32.totalorder %v90_v41, %v105_v53  ;;  %vm120_vm5 = vcmp.eq.s32.totalorder %v90_v41, %v108_v54 }
  0xc2   :  { %4115 = vmatmul.mubr.msk.f32.gmra.mrb[2].mxu0 %vm118_vm3, %v5391_v46 }
  0xc3   :  { %4117 = vmatprep.mubr.msk.f32.mxu0 %vm119_vm4, %v5391_v46  ;;  %4796 = vmatpush3.bf16.msra.mxu0 %v5609_v52 }
  0xc4   :  { %v111_v55 = vpop.permute.xlu0 %110  ;;  %4809 = vmatprep.subr.bf16.mxu0 %v5390_v39  ;;  %v114_v56 = vpop.permute.xlu1 %113 }
  0xc5   :  { %vm121_vm6 = vcmp.eq.s32.totalorder %v90_v41, %v111_v55  ;;  %vm122_vm7 = vcmp.eq.s32.totalorder %v90_v41, %v114_v56  ;;  %v5673_v41 = vpack.c.bf16 %v534_v40, %v533_v37  ;;  %v741_v37 = vld [vmem:[%s6487_s11 + $0x38] sm:$0xff] }
  0xc6   :  { %4118 = vmatmul.mubr.msk.f32.gmra.mrb[4].mxu0 %vm120_vm5, %v5391_v46  ;;  %v5783_v40 = vpack.c.bf16 %v741_v37, %v740_v36 }
  0xc7   :  { %4120 = vmatprep.mubr.msk.f32.mxu0 %vm121_vm6, %v5391_v46 }
  0xc8   :  { %v503_v31 = vpop.permute.xlu1 %502 }
  0xca   :  { %4121 = vmatmul.mubr.msk.f32.gmra.mrb[6].mxu0 %vm122_vm7, %v5391_v46  ;;  %v538_v46 = vld [vmem:[%s6481_s5 + $0x38] sm:$0xff] }
  0xcb   :  { %4151 = vmatprep.mubr.msk.f32.mxu0 %vm5392_vm9, %v5393_v59  ;;  %v5694_v49 = vpack.c.bf16 %v538_v46, %v537_v45  ;;  %v5793_v45 = vpack.c.bf16 %v743_v43, %v742_v42  ;;  %v744_v46 = vld [vmem:[%s6487_s11 + $0x50] sm:$0xff] }
  0xce   :  { %4152 = vmatmul.mubr.msk.f32.vlgmr.msra.gmra.mrb[8].mxu0 %vm271_vm8, %v409_v57 }
  0xcf   :  { %4181 = vmatprep.mubr.msk.f32.mxu0 %vm5392_vm9, %v5393_v59 }
 0x191   :  { %v4113_v60 = vpop.f32.mrb[0].mxu0 }
 0x192   :  { %v221_v61 = vpop.f32.mrb[1].mxu0 }
 0x193   :  { %4131 = vmatprep.mubr.msk.f32.mxu1 %vm271_vm8, %v221_v61 }
 0x194   :  { %4132 = vmatmul.mubr.msk.f32.vlgmr.msra.gmra.mrb[0].mxu1 %vm271_vm8, %v4113_v60 }
 0x195   :  { %v4116_v62 = vpop.f32.mrb[2].mxu0  ;;  %4799 = vmatpush3.bf16.msra.mxu1 %v5667_v38 }
 0x196   :  { %v231_v63 = vpop.f32.mrb[3].mxu0  ;;  %4800 = vmatprep.subr.bf16.mxu1 %v5390_v39 }
 0x197   :  { %4134 = vmatprep.mubr.msk.f32.mxu1 %vm271_vm8, %v231_v63 }
 0x198   :  { %4135 = vmatmul.mubr.msk.f32.gmra.mrb[2].mxu1 %vm271_vm8, %v4116_v62 }
 0x199   :  { %v4119_v0 = vpop.f32.mrb[4].mxu0  ;;  %4802 = vmatpush3.bf16.msra.mxu1 %v5673_v41 }
 0x19a   :  { %v241_v1 = vpop.f32.mrb[5].mxu0  ;;  %4803 = vmatprep.subr.bf16.mxu1 %v5390_v39 }
 0x19b   :  { %4137 = vmatprep.mubr.msk.f32.mxu1 %vm271_vm8, %v241_v1 }
 0x19c   :  { %4138 = vmatmul.mubr.msk.f32.gmra.mrb[4].mxu1 %vm271_vm8, %v4119_v0 }
 0x19d   :  { %v4122_v2 = vpop.f32.mrb[6].mxu0  ;;  %4805 = vmatpush3.bf16.msra.mxu1 %v5683_v44 }
 0x19e   :  { %v251_v3 = vpop.f32.mrb[7].mxu0  ;;  %4806 = vmatprep.subr.bf16.mxu1 %v5390_v39 }
 0x19f   :  { %4140 = vmatprep.mubr.msk.f32.mxu1 %vm271_vm8, %v251_v3 }
 0x1a0   :  { %4141 = vmatmul.mubr.msk.f32.gmra.mrb[6].mxu1 %vm271_vm8, %v4122_v2 }
 0x1a1   :  { %4170 = vmatprep.mubr.msk.f32.mxu1 %vm5392_vm9, %v5393_v59  ;;  %v489_v4 = vpop.f32.mrb[8].mxu0  ;;  %4808 = vmatpush3.bf16.msra.mxu1 %v5694_v49 }
 0x1a2   :  { %v4153_v5 = vpop.f32.mrb[9].mxu0  ;;  %4815 = vmatprep.subr.bf16.mxu1 %v5390_v39 }
 0x267   :  { %v4133_v7 = vpop.f32.mrb[0].mxu1 }
 0x268   :  { %v5639_v8 = vadd.f32 %v4133_v7, %v3680_v6  ;;  %v362_v9 = vpop.f32.mrb[1].mxu1 }
 0x269   :  { %v363_v10 = vadd.f32 %v3680_v6, %v362_v9 }
 0x26b   :  { %v493_v11 = vadd.f32 %v489_v4, %v363_v10  ;;  %v4136_v12 = vpop.f32.mrb[2].mxu1 }
 0x26c   :  { %v5641_v13 = vadd.f32 %v4136_v12, %v3680_v6  ;;  %v372_v14 = vpop.f32.mrb[3].mxu1  ;;  %v649_v12 = vld [vmem:[%s6485_s9 + $0x8] sm:$0xff] }
 0x26d   :  { %5188 = vtanh.f32 %v493_v11  ;;  %v5643_v15 = vadd.f32 %v3680_v6, %v372_v14  ;;  %v3692_v25 = vmul.f32 -1.442695, %v493_v11  ;;  %v648_v11 = vld [vmem:[%s6485_s9] sm:$0xff]  ;;  %v650_v14 = vld [vmem:[%s6485_s9 + $0x10] sm:$0xff] }
 0x26f   :  { %v4139_v16 = vpop.f32.mrb[4].mxu1  ;;  %5190 = vpow2.f32 %v3692_v25  ;;  %v735_v25 = vld [vmem:[%s6487_s11 + $0x8] sm:$0xff] }
 0x270   :  { %v5645_v17 = vadd.f32 %v4139_v16, %v3680_v6  ;;  %v382_v18 = vpop.f32.mrb[5].mxu1  ;;  %v5732_v16 = vpack.c.bf16 %v649_v12, %v648_v11  ;;  %v5871_v12 = vld [vmem:[#allocation7] ss:$0 sm:$0xff] }
 0x271   :  { %v5647_v19 = vadd.f32 %v3680_v6, %v382_v18  ;;  %v651_v18 = vld [vmem:[%s6485_s9 + $0x18] sm:$0xff] }
 0x272   :  { %4811 = vmatpush3.bf16.msra.mxu0 %v5732_v16 }
 0x273   :  { %v4142_v20 = vpop.f32.mrb[6].mxu1  ;;  %4812 = vmatprep.subr.bf16.mxu0 %v5390_v39 }
 0x274   :  { %v5649_v21 = vadd.f32 %v4142_v20, %v3680_v6  ;;  %v392_v22 = vpop.f32.mrb[7].mxu1  ;;  %v5738_v20 = vpack.c.bf16 %v651_v18, %v650_v14 }
 0x275   :  { %v5651_v23 = vadd.f32 %v3680_v6, %v392_v22 }
 0x276   :  { %4814 = vmatpush3.bf16.msra.mxu0 %v5738_v20 }
 0x277   :  { %v5189_v24 = vpop.eup %5188  ;;  %4839 = vmatprep.subr.bf16.mxu0 %v5390_v39 }
 0x278   :  { %507 = vrot.lane.b32.xlu0 %v5189_v24, %s5395_s4  ;;  %v734_v24 = vld [vmem:[%s6487_s11] sm:$0xff] }
 0x279   :  { %v5191_v26 = vpop.eup %5190 }
 0x27a   :  { %v497_v27 = vadd.f32 1.0, %v5191_v26  ;;  %v736_v26 = vld [vmem:[%s6487_s11 + $0x10] sm:$0xff] }
 0x27c   :  { %5192 = vrcp.f32 %v497_v27  ;;  %v5753_v27 = vpack.c.bf16 %v735_v25, %v734_v24 }
 0x286   :  { %v5193_v28 = vpop.eup %5192 }
 0x287   :  { %v505_v32 = vmul.f32 %v5193_v28, %v503_v31 }
 0x2ea   :  { %v508_v29 = vpop.permute.xlu0 %507 }
 0x2eb   :  { %v510_v30 = vmul.f32 %v5193_v28, %v508_v29 }
 0x2ed   :  { %512 = vrot.lane.b32.xlu0 %v510_v30, %s5394_s24 }
 0x35f   :  { %v513_v33 = vpop.permute.xlu0 %512 }
 0x360   :  { %v5655_v34 = vadd.f32 %v513_v33, %v505_v32  ;;  %v738_v32 = vld [vmem:[%s6487_s11 + $0x20] sm:$0xff]  ;;  %v739_v33 = vld [vmem:[%s6487_s11 + $0x28] sm:$0xff] }
 0x361   :  { %v5773_v35 = vpack.c.bf16 %v739_v33, %v738_v32 }
 0x362   :  { %5194 = vtanh.f32 %v5655_v34 }
 0x36c   :  { %v5195_v48 = vpop.eup %5194 }
 0x36d   :  { %518 = vrot.lane.b32.xlu1 %v5195_v48, %s5395_s4  ;;  %v745_v48 = vld [vmem:[%s6487_s11 + $0x58] sm:$0xff] }
 0x371   :  { %527 = vrot.lane.b32.xlu1 %v3689_v50, %s5394_s24  ;;  %v5803_v50 = vpack.c.bf16 %v745_v48, %v744_v46 }
 0x375   :  { %628 = vrot.lane.b32.xlu1 %v3690_v51, %s5394_s24  ;;  %v746_v51 = vld [vmem:[%s6487_s11 + $0x60] sm:$0xff] }
 0x3df   :  { %v519_v53 = vpop.permute.xlu1 %518 }
 0x3e0   :  { %v521_v54 = vmul.f32 %v5193_v28, %v519_v53  ;;  %v737_v28 = vld [vmem:[%s6487_s11 + $0x18] sm:$0xff]  ;;  %v747_v53 = vld [vmem:[%s6487_s11 + $0x68] sm:$0xff] }
 0x3e1   :  { %v5761_v31 = vpack.c.bf16 %v737_v28, %v736_v26 }
 0x3e2   :  { %523 = vrot.lane.b32.xlu0 %v521_v54, %s5394_s24  ;;  %v5813_v54 = vpack.c.bf16 %v747_v53, %v746_v51 }
 0x3e3   :  { %v528_v55 = vpop.permute.xlu1 %527 }
 0x3e7   :  { %v629_v6 = vpop.permute.xlu1 %628 }
 0x454   :  { %v5708_v56 = vpop.permute.xlu0 %523 }
 0x455   :  { %v530_v57 = vsel %vm271_vm8, %v5708_v56, %v528_v55 }
 0x456   :  { %4171 = vmatmul.mubr.msk.f32.vlgmr.msra.gmra.mrb[8].mxu1 %vm546_vm10, %v530_v57  ;;  %v749_v57 = vld [vmem:[%s6487_s11 + $0x78] sm:$0xff] }
 0x457   :  { %4216 = vmatprep.mubr.msk.f32.mxu1 %vm5392_vm9, %v5393_v59  ;;  %4817 = vmatpush3.bf16.msra.mxu1 %v5753_v27 }
 0x458   :  { %4818 = vmatprep.subr.bf16.mxu1 %v5390_v39 }
 0x45b   :  { %4820 = vmatpush3.bf16.msra.mxu1 %v5761_v31 }
 0x45c   :  { %4821 = vmatprep.subr.bf16.mxu1 %v5390_v39 }
 0x45f   :  { %4823 = vmatpush3.bf16.msra.mxu1 %v5773_v35 }
 0x460   :  { %4824 = vmatprep.subr.bf16.mxu1 %v5390_v39 }
 0x463   :  { %4826 = vmatpush3.bf16.msra.mxu1 %v5783_v40 }
 0x464   :  { %4827 = vmatprep.subr.bf16.mxu1 %v5390_v39 }
 0x467   :  { %4829 = vmatpush3.bf16.msra.mxu1 %v5793_v45 }
 0x468   :  { %4830 = vmatprep.subr.bf16.mxu1 %v5390_v39 }
 0x46b   :  { %4832 = vmatpush3.bf16.msra.mxu1 %v5803_v50 }
 0x46c   :  { %4833 = vmatprep.subr.bf16.mxu1 %v5390_v39 }
 0x46f   :  { %4835 = vmatpush3.bf16.msra.mxu1 %v5813_v54 }
 0x470   :  { %4836 = vmatprep.subr.bf16.mxu1 %v5390_v39 }
 0x529   :  { %v616_v60 = vpop.f32.mrb[8].mxu1 }
 0x52a   :  { %v617_v61 = vadd.f32 %v5715_v58, %v616_v60  ;;  %v4172_v62 = vpop.f32.mrb[9].mxu1 }
 0x52c   :  { %5196 = vtanh.f32 %v617_v61  ;;  %v3695_v0 = vmul.f32 -1.442695, %v617_v61  ;;  %v5847_v61 = vld [vmem:[#allocation5] ss:$0 sm:$0xff] }
 0x52e   :  { %5198 = vpow2.f32 %v3695_v0 }
 0x536   :  { %v5197_v63 = vpop.eup %5196 }
 0x537   :  { %633 = vrot.lane.b32.xlu0 %v5197_v63, %s5395_s4 }
 0x538   :  { %v5199_v1 = vpop.eup %5198 }
 0x539   :  { %v623_v2 = vadd.f32 1.0, %v5199_v1 }
 0x53b   :  { %5200 = vrcp.f32 %v623_v2 }
 0x545   :  { %v5201_v3 = vpop.eup %5200 }
 0x546   :  { %v631_v7 = vmul.f32 %v5201_v3, %v629_v6 }
 0x5a9   :  { %v634_v4 = vpop.permute.xlu0 %633 }
 0x5aa   :  { %v636_v5 = vmul.f32 %v5201_v3, %v634_v4 }
 0x5ac   :  { %638 = vrot.lane.b32.xlu0 %v636_v5, %s5394_s24 }
 0x61e   :  { %v639_v9 = vpop.permute.xlu0 %638 }
 0x61f   :  { %v5720_v10 = vadd.f32 %v639_v9, %v631_v7 }
 0x621   :  { %5202 = vtanh.f32 %v5720_v10 }
 0x62b   :  { %v5203_v22 = vpop.eup %5202 }
 0x62c   :  { %644 = vrot.lane.b32.xlu1 %v5203_v22, %s5395_s4 }
 0x69e   :  { %v645_v29 = vpop.permute.xlu1 %644 }
 0x69f   :  { %v5758_v30 = vmul.f32 %v5201_v3, %v645_v29 }
 0x6a1   :  { %660 = vrot.lane.b32.xlu0 %v5758_v30, %s5394_s24 }
 0x713   :  { %v661_v55 = vpop.permute.xlu0 %660 }
 0x714   :  { %4182 = vmatmul.mubr.msk.f32.vlgmr.msra.gmra.mrb[10].mxu0 %vm271_vm8, %v661_v55 }
 0x715   :  { %4841 = vmatpush3.bf16.msra.mxu0 %v5600_v47  ;;  %4227 = vmatprep.mubr.msk.f32.mxu0 %vm5392_vm9, %v5393_v59 }
 0x716   :  { %4842 = vmatprep.subr.bf16.mxu0 %v5390_v39 }
 0x719   :  { %4844 = vmatpush3.bf16.msra.mxu0 %v5609_v52 }
 0x71a   :  { %4845 = vmatprep.subr.bf16.mxu0 %v5390_v39 }
 0x71c   :  { %4228 = vmatmul.mubr.msk.f32.vlgmr.msra.gmra.mrb[12].mxu0 %vm271_vm8, %v5708_v56  ;;  %v748_v56 = vld [vmem:[%s6487_s11 + $0x70] sm:$0xff] }
 0x71d   :  { %4847 = vmatpush3.bf16.msra.mxu0 %v5667_v38  ;;  %4246 = vmatprep.mubr.msk.f32.mxu0 %vm5392_vm9, %v5393_v59  ;;  %v5843_v60 = vpack.c.bf16 %v749_v57, %v748_v56 }
 0x71e   :  { %4848 = vmatprep.subr.bf16.mxu0 %v5390_v39 }
 0x71f   :  { %4838 = vmatpush3.bf16.msra.mxu1 %v5843_v60 }
 0x720   :  { %4863 = vmatprep.subr.bf16.mxu1 %v5390_v39 }
 0x721   :  { %4850 = vmatpush3.bf16.msra.mxu0 %v5673_v41 }
 0x722   :  { %4851 = vmatprep.subr.bf16.mxu0 %v5390_v39 }
 0x725   :  { %4853 = vmatpush3.bf16.msra.mxu0 %v5683_v44 }
 0x726   :  { %4854 = vmatprep.subr.bf16.mxu0 %v5390_v39 }
 0x729   :  { %4856 = vmatpush3.bf16.msra.mxu0 %v5694_v49 }
 0x72a   :  { %4857 = vmatprep.subr.bf16.mxu0 %v5390_v39 }
 0x7e7   :  { %v730_v62 = vpop.f32.mrb[10].mxu0 }
 0x7e8   :  { %v731_v63 = vadd.f32 %v5847_v61, %v730_v62  ;;  %v4183_v0 = vpop.f32.mrb[11].mxu0 }
 0x7ea   :  { %4217 = vmatmul.mubr.f32.vlgmr.msra.gmra.mrb[10].mxu1 %v731_v63 }
 0x7eb   :  { %4865 = vmatpush3.bf16.msra.mxu1 %v5753_v27  ;;  %4292 = vmatprep.mubr.msk.f32.mxu1 %vm5392_vm9, %v5393_v59 }
 0x7ec   :  { %4866 = vmatprep.subr.bf16.mxu1 %v5390_v39 }
 0x7ef   :  { %v901_v1 = vpop.f32.mrb[12].mxu0  ;;  %4868 = vmatpush3.bf16.msra.mxu1 %v5761_v31 }
 0x7f0   :  { %v905_v2 = vadd.f32 %v901_v1, %v5639_v8  ;;  %v4229_v3 = vpop.f32.mrb[13].mxu0  ;;  %4869 = vmatprep.subr.bf16.mxu1 %v5390_v39 }
 0x7f2   :  { %5204 = vtanh.f32 %v905_v2  ;;  %v3700_v8 = vmul.f32 -1.442695, %v905_v2 }
 0x7f3   :  { %4871 = vmatpush3.bf16.msra.mxu1 %v5773_v35 }
 0x7f4   :  { %4872 = vmatprep.subr.bf16.mxu1 %v5390_v39  ;;  %5206 = vpow2.f32 %v3700_v8 }
 0x7f7   :  { %4874 = vmatpush3.bf16.msra.mxu1 %v5783_v40 }
 0x7f8   :  { %4875 = vmatprep.subr.bf16.mxu1 %v5390_v39 }
 0x7fb   :  { %4877 = vmatpush3.bf16.msra.mxu1 %v5793_v45 }
 0x7fc   :  { %v5205_v4 = vpop.eup %5204  ;;  %4878 = vmatprep.subr.bf16.mxu1 %v5390_v39 }
 0x7fd   :  { %915 = vrot.lane.b32.xlu1 %v5205_v4, %s5395_s4 }
 0x7fe   :  { %v5207_v5 = vpop.eup %5206 }
 0x7ff   :  { %4880 = vmatpush3.bf16.msra.mxu1 %v5803_v50  ;;  %v909_v6 = vadd.f32 1.0, %v5207_v5 }
 0x800   :  { %4881 = vmatprep.subr.bf16.mxu1 %v5390_v39 }
 0x801   :  { %5208 = vrcp.f32 %v909_v6 }
 0x803   :  { %4883 = vmatpush3.bf16.msra.mxu1 %v5813_v54 }
 0x804   :  { %4884 = vmatprep.subr.bf16.mxu1 %v5390_v39 }
 0x807   :  { %4886 = vmatpush3.bf16.msra.mxu1 %v5843_v60 }
 0x808   :  { %4911 = vmatprep.subr.bf16.mxu1 %v5390_v39 }
 0x80b   :  { %v5209_v7 = vpop.eup %5208 }
 0x80c   :  { %v913_v24 = vmul.f32 %v5209_v7, %v5655_v34 }
 0x86f   :  { %v916_v9 = vpop.permute.xlu1 %915 }
 0x870   :  { %v918_v11 = vmul.f32 %v5209_v7, %v916_v9 }
 0x872   :  { %920 = vrot.lane.b32.xlu0 %v918_v11, %s5394_s24 }
 0x8bd   :  { %v823_v14 = vpop.f32.mrb[10].mxu1 }
 0x8be   :  { %v824_v18 = vadd.f32 %v5871_v12, %v823_v14  ;;  %v4218_v22 = vpop.f32.mrb[11].mxu1 }
 0x8c0   :  { %827 = vst [vmem:[%s6489_s13] sm:$0xff] %v824_v18 }
 0x8e4   :  { %v921_v25 = vpop.permute.xlu0 %920 }
 0x8e5   :  { %v5878_v26 = vadd.f32 %v921_v25, %v913_v24 }
 0x8e7   :  { %5210 = vtanh.f32 %v5878_v26 }
 0x8f1   :  { %v5211_v28 = vpop.eup %5210 }
 0x8f2   :  { %926 = vrot.lane.b32.xlu1 %v5211_v28, %s5395_s4 }
 0x8f6   :  { %934 = vrot.lane.b32.xlu1 %v5758_v30, %s5395_s4 }
 0x964   :  { %v927_v29 = vpop.permute.xlu1 %926 }
 0x965   :  { %v929_v32 = vmul.f32 %v5209_v7, %v927_v29 }
 0x967   :  { %931 = vrot.lane.b32.xlu0 %v929_v32, %s5394_s24 }
 0x968   :  { %v935_v33 = vpop.permute.xlu1 %934 }
 0x9d9   :  { %v932_v36 = vpop.permute.xlu0 %931 }
 0x9da   :  { %v937_v37 = vsel %vm271_vm8, %v932_v36, %v935_v33 }
 0x9db   :  { %4247 = vmatmul.mubr.msk.f32.vlgmr.msra.gmra.mrb[14].mxu0 %vm546_vm10, %v937_v37 }
 0x9dc   :  { %4859 = vmatpush3.bf16.msra.mxu0 %v5732_v16  ;;  %4257 = vmatprep.mubr.msk.f32.mxu0 %vm5392_vm9, %v5393_v59 }
 0x9dd   :  { %4860 = vmatprep.subr.bf16.mxu0 %v5390_v39 }
 0x9e0   :  { %4862 = vmatpush3.bf16.msra.mxu0 %v5738_v20 }
 0x9e1   :  { %4887 = vmatprep.subr.bf16.mxu0 %v5390_v39 }
 0xaae   :  { %v1022_v34 = vpop.f32.mrb[14].mxu0 }
 0xaaf   :  { %v1023_v30 = vadd.f32 %v5715_v58, %v1022_v34  ;;  %v4248_v42 = vpop.f32.mrb[15].mxu0 }
 0xab1   :  { %5212 = vtanh.f32 %v1023_v30  ;;  %v3703_v46 = vmul.f32 -1.442695, %v1023_v30 }
 0xab3   :  { %5214 = vpow2.f32 %v3703_v46 }
 0xabb   :  { %v5213_v43 = vpop.eup %5212 }
 0xabc   :  { %1035 = vrot.lane.b32.xlu0 %v5213_v43, %s5395_s4 }
 0xabd   :  { %v5215_v48 = vpop.eup %5214 }
 0xabe   :  { %v1029_v51 = vadd.f32 1.0, %v5215_v48 }
 0xac0   :  { %5216 = vrcp.f32 %v1029_v51 }
 0xaca   :  { %v5217_v53 = vpop.eup %5216 }
 0xacb   :  { %v1033_v57 = vmul.f32 %v5217_v53, %v5720_v10 }
 0xb2e   :  { %v1036_v55 = vpop.permute.xlu0 %1035 }
 0xb2f   :  { %v1038_v56 = vmul.f32 %v5217_v53, %v1036_v55 }
 0xb31   :  { %1040 = vrot.lane.b32.xlu1 %v1038_v56, %s5394_s24 }
 0xba3   :  { %v1041_v62 = vpop.permute.xlu1 %1040 }
 0xba4   :  { %v5897_v63 = vadd.f32 %v1041_v62, %v1033_v57 }
 0xba6   :  { %5218 = vtanh.f32 %v5897_v63 }
 0xbb0   :  { %v5219_v0 = vpop.eup %5218 }
 0xbb1   :  { %1046 = vrot.lane.b32.xlu0 %v5219_v0, %s5395_s4 }
 0xc23   :  { %v1047_v1 = vpop.permute.xlu0 %1046 }
 0xc24   :  { %v5901_v2 = vmul.f32 %v5217_v53, %v1047_v1 }
 0xc26   :  { %1062 = vrot.lane.b32.xlu1 %v5901_v2, %s5394_s24 }
 0xc98   :  { %v1063_v3 = vpop.permute.xlu1 %1062 }
 0xc99   :  { %4258 = vmatmul.mubr.msk.f32.vlgmr.msra.gmra.mrb[16].mxu0 %vm271_vm8, %v1063_v3 }
 0xc9a   :  { %4889 = vmatpush3.bf16.msra.mxu0 %v5600_v47  ;;  %4303 = vmatprep.mubr.msk.f32.mxu0 %vm5392_vm9, %v5393_v59 }
 0xc9b   :  { %4890 = vmatprep.subr.bf16.mxu0 %v5390_v39 }
 0xc9e   :  { %4892 = vmatpush3.bf16.msra.mxu0 %v5609_v52 }
 0xc9f   :  { %4893 = vmatprep.subr.bf16.mxu0 %v5390_v39 }
 0xca1   :  { %4304 = vmatmul.mubr.msk.f32.vlgmr.msra.gmra.mrb[18].mxu0 %vm271_vm8, %v932_v36 }
 0xca2   :  { %4895 = vmatpush3.bf16.msra.mxu0 %v5667_v38  ;;  %4322 = vmatprep.mubr.msk.f32.mxu0 %vm5392_vm9, %v5393_v59 }
 0xca3   :  { %4896 = vmatprep.subr.bf16.mxu0 %v5390_v39 }
 0xca6   :  { %4898 = vmatpush3.bf16.msra.mxu0 %v5673_v41 }
 0xca7   :  { %4899 = vmatprep.subr.bf16.mxu0 %v5390_v39 }
 0xcaa   :  { %4901 = vmatpush3.bf16.msra.mxu0 %v5683_v44 }
 0xcab   :  { %4902 = vmatprep.subr.bf16.mxu0 %v5390_v39 }
 0xcae   :  { %4904 = vmatpush3.bf16.msra.mxu0 %v5694_v49 }
 0xcaf   :  { %4905 = vmatprep.subr.bf16.mxu0 %v5390_v39 }
 0xd6c   :  { %v1132_v10 = vpop.f32.mrb[16].mxu0 }
 0xd6d   :  { %v1133_v4 = vadd.f32 %v5847_v61, %v1132_v10  ;;  %v4259_v8 = vpop.f32.mrb[17].mxu0 }
 0xd6f   :  { %4293 = vmatmul.mubr.f32.vlgmr.msra.gmra.mrb[12].mxu1 %v1133_v4 }
 0xd70   :  { %4913 = vmatpush3.bf16.msra.mxu1 %v5753_v27  ;;  %4368 = vmatprep.mubr.msk.f32.mxu1 %vm5392_vm9, %v5393_v59 }
 0xd71   :  { %4914 = vmatprep.subr.bf16.mxu1 %v5390_v39 }
 0xd74   :  { %v1303_v5 = vpop.f32.mrb[18].mxu0  ;;  %4916 = vmatpush3.bf16.msra.mxu1 %v5761_v31 }
 0xd75   :  { %v1307_v6 = vadd.f32 %v1303_v5, %v5643_v15  ;;  %v4305_v7 = vpop.f32.mrb[19].mxu0  ;;  %4917 = vmatprep.subr.bf16.mxu1 %v5390_v39 }
 0xd77   :  { %5220 = vtanh.f32 %v1307_v6  ;;  %v3708_v15 = vmul.f32 -1.442695, %v1307_v6 }
 0xd78   :  { %4919 = vmatpush3.bf16.msra.mxu1 %v5773_v35 }
 0xd79   :  { %4920 = vmatprep.subr.bf16.mxu1 %v5390_v39  ;;  %5222 = vpow2.f32 %v3708_v15 }
 0xd7c   :  { %4922 = vmatpush3.bf16.msra.mxu1 %v5783_v40 }
 0xd7d   :  { %4923 = vmatprep.subr.bf16.mxu1 %v5390_v39 }
 0xd80   :  { %4925 = vmatpush3.bf16.msra.mxu1 %v5793_v45 }
 0xd81   :  { %v5221_v9 = vpop.eup %5220  ;;  %4926 = vmatprep.subr.bf16.mxu1 %v5390_v39 }
 0xd82   :  { %1317 = vrot.lane.b32.xlu0 %v5221_v9, %s5395_s4 }
 0xd83   :  { %v5223_v11 = vpop.eup %5222 }
 0xd84   :  { %4928 = vmatpush3.bf16.msra.mxu1 %v5803_v50  ;;  %v1311_v14 = vadd.f32 1.0, %v5223_v11 }
 0xd85   :  { %4929 = vmatprep.subr.bf16.mxu1 %v5390_v39 }
 0xd86   :  { %5224 = vrcp.f32 %v1311_v14 }
 0xd88   :  { %4931 = vmatpush3.bf16.msra.mxu1 %v5813_v54 }
 0xd89   :  { %4932 = vmatprep.subr.bf16.mxu1 %v5390_v39 }
 0xd8c   :  { %4934 = vmatpush3.bf16.msra.mxu1 %v5843_v60 }
 0xd8d   :  { %4959 = vmatprep.subr.bf16.mxu1 %v5390_v39 }
 0xd90   :  { %v5225_v18 = vpop.eup %5224 }
 0xd91   :  { %v1315_v32 = vmul.f32 %v5225_v18, %v5878_v26 }
 0xdf4   :  { %v1318_v22 = vpop.permute.xlu0 %1317 }
 0xdf5   :  { %v1320_v24 = vmul.f32 %v5225_v18, %v1318_v22 }
 0xdf7   :  { %1322 = vrot.lane.b32.xlu1 %v1320_v24, %s5394_s24 }
 0xe42   :  { %v1225_v25 = vpop.f32.mrb[12].mxu1 }
 0xe43   :  { %v1226_v28 = vadd.f32 %v5871_v12, %v1225_v25  ;;  %v4294_v29 = vpop.f32.mrb[13].mxu1 }
 0xe45   :  { %1229 = vst [vmem:[%s6489_s13 + $0x8] sm:$0xff] %v1226_v28 }
 0xe69   :  { %v1323_v33 = vpop.permute.xlu1 %1322 }
 0xe6a   :  { %v5950_v36 = vadd.f32 %v1323_v33, %v1315_v32 }
 0xe6c   :  { %5226 = vtanh.f32 %v5950_v36 }
 0xe76   :  { %v5227_v37 = vpop.eup %5226 }
 0xe77   :  { %1328 = vrot.lane.b32.xlu0 %v5227_v37, %s5395_s4 }
 0xe7b   :  { %1336 = vrot.lane.b32.xlu0 %v5901_v2, %s5395_s4 }
 0xee9   :  { %v1329_v34 = vpop.permute.xlu0 %1328 }
 0xeea   :  { %v1331_v30 = vmul.f32 %v5225_v18, %v1329_v34 }
 0xeec   :  { %1333 = vrot.lane.b32.xlu1 %v1331_v30, %s5394_s24 }
 0xeed   :  { %v1337_v42 = vpop.permute.xlu0 %1336 }
 0xf5e   :  { %v1334_v43 = vpop.permute.xlu1 %1333 }
 0xf5f   :  { %v1339_v46 = vsel %vm271_vm8, %v1334_v43, %v1337_v42 }
 0xf60   :  { %4323 = vmatmul.mubr.msk.f32.vlgmr.msra.gmra.mrb[20].mxu0 %vm546_vm10, %v1339_v46 }
 0xf61   :  { %4907 = vmatpush3.bf16.msra.mxu0 %v5732_v16  ;;  %4333 = vmatprep.mubr.msk.f32.mxu0 %vm5392_vm9, %v5393_v59 }
 0xf62   :  { %4908 = vmatprep.subr.bf16.mxu0 %v5390_v39 }
 0xf65   :  { %4910 = vmatpush3.bf16.msra.mxu0 %v5738_v20 }
 0xf66   :  { %4935 = vmatprep.subr.bf16.mxu0 %v5390_v39 }
0x1033   :  { %v1424_v26 = vpop.f32.mrb[20].mxu0 }
0x1034   :  { %v1425_v48 = vadd.f32 %v5715_v58, %v1424_v26  ;;  %v4324_v51 = vpop.f32.mrb[21].mxu0 }
0x1035   :  { %v2035_v51 = vld [vmem:[%s6479_s3] sm:$0xff] }
0x1036   :  { %5228 = vtanh.f32 %v1425_v48  ;;  %v3711_v55 = vmul.f32 -1.442695, %v1425_v48 }
0x1038   :  { %5230 = vpow2.f32 %v3711_v55 }
0x1040   :  { %v5229_v53 = vpop.eup %5228 }
0x1041   :  { %1437 = vrot.lane.b32.xlu1 %v5229_v53, %s5395_s4  ;;  %v2036_v53 = vld [vmem:[%s6479_s3 + $0x8] sm:$0xff] }
0x1042   :  { %v5231_v56 = vpop.eup %5230  ;;  %v6055_v55 = vpack.c.bf16 %v2036_v53, %v2035_v51  ;;  %v2256_v51 = vld [vmem:[%s6485_s9] sm:$0xff]  ;;  %v2257_v53 = vld [vmem:[%s6485_s9 + $0x8] sm:$0xff] }
0x1043   :  { %v1431_v57 = vadd.f32 1.0, %v5231_v56  ;;  %v2037_v56 = vld [vmem:[%s6479_s3 + $0x10] sm:$0xff] }
0x1045   :  { %5232 = vrcp.f32 %v1431_v57  ;;  %v2038_v57 = vld [vmem:[%s6479_s3 + $0x18] sm:$0xff] }
0x104f   :  { %v5233_v62 = vpop.eup %5232 }
0x1050   :  { %v1435_v2 = vmul.f32 %v5233_v62, %v5897_v63 }
0x10b3   :  { %v1438_v0 = vpop.permute.xlu1 %1437 }
0x10b4   :  { %v1440_v1 = vmul.f32 %v5233_v62, %v1438_v0  ;;  %v6065_v0 = vpack.c.bf16 %v2038_v57, %v2037_v56  ;;  %v2258_v56 = vld [vmem:[%s6485_s9 + $0x10] sm:$0xff]  ;;  %v6158_v57 = vpack.c.bf16 %v2257_v53, %v2256_v51 }
0x10b6   :  { %1442 = vrot.lane.b32.xlu0 %v1440_v1, %s5394_s24 }
0x1128   :  { %v1443_v3 = vpop.permute.xlu0 %1442 }
0x1129   :  { %v5969_v10 = vadd.f32 %v1443_v3, %v1435_v2 }
0x112b   :  { %5234 = vtanh.f32 %v5969_v10 }
0x1135   :  { %v5235_v4 = vpop.eup %5234 }
0x1136   :  { %1448 = vrot.lane.b32.xlu1 %v5235_v4, %s5395_s4 }
0x11a8   :  { %v1449_v8 = vpop.permute.xlu1 %1448 }
0x11a9   :  { %v5973_v5 = vmul.f32 %v5233_v62, %v1449_v8 }
0x11ab   :  { %1464 = vrot.lane.b32.xlu0 %v5973_v5, %s5394_s24 }
0x121d   :  { %v1465_v6 = vpop.permute.xlu0 %1464 }
0x121e   :  { %4334 = vmatmul.mubr.msk.f32.vlgmr.msra.gmra.mrb[22].mxu0 %vm271_vm8, %v1465_v6 }
0x121f   :  { %4937 = vmatpush3.bf16.msra.mxu0 %v5600_v47  ;;  %4379 = vmatprep.mubr.msk.f32.mxu0 %vm5392_vm9, %v5393_v59 }
0x1220   :  { %4938 = vmatprep.subr.bf16.mxu0 %v5390_v39 }
0x1223   :  { %4940 = vmatpush3.bf16.msra.mxu0 %v5609_v52 }
0x1224   :  { %4941 = vmatprep.subr.bf16.mxu0 %v5390_v39 }
0x1226   :  { %4380 = vmatmul.mubr.msk.f32.vlgmr.msra.gmra.mrb[24].mxu0 %vm271_vm8, %v1334_v43 }
0x1227   :  { %4943 = vmatpush3.bf16.msra.mxu0 %v5667_v38  ;;  %4398 = vmatprep.mubr.msk.f32.mxu0 %vm5392_vm9, %v5393_v59 }
0x1228   :  { %4944 = vmatprep.subr.bf16.mxu0 %v5390_v39 }
0x122b   :  { %4946 = vmatpush3.bf16.msra.mxu0 %v5673_v41 }
0x122c   :  { %4947 = vmatprep.subr.bf16.mxu0 %v5390_v39 }
0x122f   :  { %4949 = vmatpush3.bf16.msra.mxu0 %v5683_v44 }
0x1230   :  { %4950 = vmatprep.subr.bf16.mxu0 %v5390_v39 }
0x1233   :  { %4952 = vmatpush3.bf16.msra.mxu0 %v5694_v49 }
0x1234   :  { %4953 = vmatprep.subr.bf16.mxu0 %v5390_v39 }
0x12f1   :  { %v1534_v47 = vpop.f32.mrb[22].mxu0 }
0x12f2   :  { %v1535_v52 = vadd.f32 %v5847_v61, %v1534_v47  ;;  %v4335_v38 = vpop.f32.mrb[23].mxu0 }
0x12f4   :  { %4369 = vmatmul.mubr.f32.vlgmr.msra.gmra.mrb[14].mxu1 %v1535_v52 }
0x12f5   :  { %4961 = vmatpush3.bf16.msra.mxu1 %v5753_v27  ;;  %4444 = vmatprep.mubr.msk.f32.mxu1 %vm5392_vm9, %v5393_v59 }
0x12f6   :  { %4962 = vmatprep.subr.bf16.mxu1 %v5390_v39 }
0x12f9   :  { %v1705_v41 = vpop.f32.mrb[24].mxu0  ;;  %4964 = vmatpush3.bf16.msra.mxu1 %v5761_v31 }
0x12fa   :  { %v1709_v44 = vadd.f32 %v1705_v41, %v5641_v13  ;;  %v4381_v49 = vpop.f32.mrb[25].mxu0  ;;  %4965 = vmatprep.subr.bf16.mxu1 %v5390_v39 }
0x12fc   :  { %5236 = vtanh.f32 %v1709_v44  ;;  %v3716_v13 = vmul.f32 -1.442695, %v1709_v44 }
0x12fd   :  { %4967 = vmatpush3.bf16.msra.mxu1 %v5773_v35 }
0x12fe   :  { %4968 = vmatprep.subr.bf16.mxu1 %v5390_v39  ;;  %5238 = vpow2.f32 %v3716_v13 }
0x1301   :  { %4970 = vmatpush3.bf16.msra.mxu1 %v5783_v40 }
0x1302   :  { %4971 = vmatprep.subr.bf16.mxu1 %v5390_v39 }
0x1305   :  { %4973 = vmatpush3.bf16.msra.mxu1 %v5793_v45 }
0x1306   :  { %v5237_v27 = vpop.eup %5236  ;;  %4974 = vmatprep.subr.bf16.mxu1 %v5390_v39 }
0x1307   :  { %1719 = vrot.lane.b32.xlu1 %v5237_v27, %s5395_s4 }
0x1308   :  { %v5239_v31 = vpop.eup %5238 }
0x1309   :  { %4976 = vmatpush3.bf16.msra.mxu1 %v5803_v50  ;;  %v1713_v35 = vadd.f32 1.0, %v5239_v31 }
0x130a   :  { %4977 = vmatprep.subr.bf16.mxu1 %v5390_v39 }
0x130b   :  { %5240 = vrcp.f32 %v1713_v35  ;;  %v2144_v35 = vld [vmem:[%s6481_s5] sm:$0xff] }
0x130d   :  { %4979 = vmatpush3.bf16.msra.mxu1 %v5813_v54 }
0x130e   :  { %4980 = vmatprep.subr.bf16.mxu1 %v5390_v39 }
0x1311   :  { %4982 = vmatpush3.bf16.msra.mxu1 %v5843_v60 }
0x1312   :  { %5007 = vmatprep.subr.bf16.mxu1 %v5390_v39 }
0x1315   :  { %v5241_v40 = vpop.eup %5240 }
0x1316   :  { %v1717_v60 = vmul.f32 %v5241_v40, %v5950_v36 }
0x1379   :  { %v1720_v45 = vpop.permute.xlu1 %1719 }
0x137a   :  { %v1722_v63 = vmul.f32 %v5241_v40, %v1720_v45 }
0x137c   :  { %1724 = vrot.lane.b32.xlu0 %v1722_v63, %s5394_s24  ;;  %v2147_v63 = vld [vmem:[%s6481_s5 + $0x18] sm:$0xff] }
0x13c7   :  { %v1627_v50 = vpop.f32.mrb[14].mxu1 }
0x13c8   :  { %v1628_v7 = vadd.f32 %v5871_v12, %v1627_v50  ;;  %v4370_v54 = vpop.f32.mrb[15].mxu1 }
0x13c9   :  { %v2149_v54 = vld [vmem:[%s6481_s5 + $0x28] sm:$0xff] }
0x13ca   :  { %1631 = vst [vmem:[%s6489_s13 + $0x10] sm:$0xff] %v1628_v7  ;;  %v2148_v7 = vld [vmem:[%s6481_s5 + $0x20] sm:$0xff] }
0x13ee   :  { %v1725_v9 = vpop.permute.xlu0 %1724 }
0x13ef   :  { %v6022_v15 = vadd.f32 %v1725_v9, %v1717_v60  ;;  %v6114_v60 = vpack.c.bf16 %v2149_v54, %v2148_v7  ;;  %v2150_v9 = vld [vmem:[%s6481_s5 + $0x30] sm:$0xff]  ;;  %v2355_v7 = vld [vmem:[%s6487_s11 + $0x68] sm:$0xff] }
0x13f1   :  { %5242 = vtanh.f32 %v6022_v15 }
0x13fb   :  { %v5243_v11 = vpop.eup %5242 }
0x13fc   :  { %1730 = vrot.lane.b32.xlu1 %v5243_v11, %s5395_s4 }
0x1400   :  { %1738 = vrot.lane.b32.xlu1 %v5973_v5, %s5395_s4 }
0x146e   :  { %v1731_v14 = vpop.permute.xlu1 %1730 }
0x146f   :  { %v1733_v18 = vmul.f32 %v5241_v40, %v1731_v14  ;;  %v2146_v40 = vld [vmem:[%s6481_s5 + $0x10] sm:$0xff] }
0x1470   :  { %v6104_v50 = vpack.c.bf16 %v2147_v63, %v2146_v40  ;;  %v2354_v63 = vld [vmem:[%s6487_s11 + $0x60] sm:$0xff] }
0x1471   :  { %1735 = vrot.lane.b32.xlu0 %v1733_v18, %s5394_s24  ;;  %v6239_v54 = vpack.c.bf16 %v2355_v7, %v2354_v63 }
0x1472   :  { %v1739_v22 = vpop.permute.xlu1 %1738 }
0x14e3   :  { %v1736_v24 = vpop.permute.xlu0 %1735 }
0x14e4   :  { %v1741_v25 = vsel %vm271_vm8, %v1736_v24, %v1739_v22 }
0x14e5   :  { %4399 = vmatmul.mubr.msk.f32.vlgmr.msra.gmra.mrb[26].mxu0 %vm546_vm10, %v1741_v25 }
0x14e6   :  { %4955 = vmatpush3.bf16.msra.mxu0 %v5732_v16  ;;  %4409 = vmatprep.mubr.msk.f32.mxu0 %vm5392_vm9, %v5393_v59 }
0x14e7   :  { %4956 = vmatprep.subr.bf16.mxu0 %v5390_v39 }
0x14ea   :  { %4958 = vmatpush3.bf16.msra.mxu0 %v5738_v20 }
0x14eb   :  { %4983 = vmatprep.subr.bf16.mxu0 %v5390_v39 }
0x15b8   :  { %v1826_v28 = vpop.f32.mrb[26].mxu0 }
0x15b9   :  { %v1827_v29 = vadd.f32 %v5715_v58, %v1826_v28  ;;  %v4400_v32 = vpop.f32.mrb[27].mxu0 }
0x15bb   :  { %5244 = vtanh.f32 %v1827_v29  ;;  %v3719_v36 = vmul.f32 -1.442695, %v1827_v29  ;;  %v6140_v29 = vld [vmem:[#allocation3] ss:$0 sm:$0xff] }
0x15bd   :  { %5246 = vpow2.f32 %v3719_v36 }
0x15c5   :  { %v5245_v33 = vpop.eup %5244 }
0x15c6   :  { %1839 = vrot.lane.b32.xlu0 %v5245_v33, %s5395_s4 }
0x15c7   :  { %v5247_v16 = vpop.eup %5246 }
0x15c8   :  { %v1833_v37 = vadd.f32 1.0, %v5247_v16 }
0x15ca   :  { %5248 = vrcp.f32 %v1833_v37 }
0x15d4   :  { %v5249_v34 = vpop.eup %5248 }
0x15d5   :  { %v1837_v20 = vmul.f32 %v5249_v34, %v5969_v10 }
0x1638   :  { %v1840_v30 = vpop.permute.xlu0 %1839 }
0x1639   :  { %v1842_v42 = vmul.f32 %v5249_v34, %v1840_v30 }
0x163b   :  { %1844 = vrot.lane.b32.xlu1 %v1842_v42, %s5394_s24 }
0x16ad   :  { %v1845_v43 = vpop.permute.xlu1 %1844 }
0x16ae   :  { %v6041_v46 = vadd.f32 %v1845_v43, %v1837_v20 }
0x16b0   :  { %5250 = vtanh.f32 %v6041_v46 }
0x16ba   :  { %v5251_v58 = vpop.eup %5250 }
0x16bb   :  { %1850 = vrot.lane.b32.xlu0 %v5251_v58, %s5395_s4 }
0x172d   :  { %v1851_v26 = vpop.permute.xlu0 %1850 }
0x172e   :  { %v6045_v48 = vmul.f32 %v5249_v34, %v1851_v26 }
0x1730   :  { %1866 = vrot.lane.b32.xlu1 %v6045_v48, %s5394_s24 }
0x17a2   :  { %v1867_v62 = vpop.permute.xlu1 %1866 }
0x17a3   :  { %4410 = vmatmul.mubr.msk.f32.vlgmr.msra.gmra.mrb[28].mxu0 %vm271_vm8, %v1867_v62 }
0x17a4   :  { %4985 = vmatpush3.bf16.msra.mxu0 %v6055_v55  ;;  %4455 = vmatprep.mubr.msk.f32.mxu0 %vm5392_vm9, %v5393_v59 }
0x17a5   :  { %4986 = vmatprep.subr.bf16.mxu0 %v5390_v39 }
0x17a8   :  { %4988 = vmatpush3.bf16.msra.mxu0 %v6065_v0 }
0x17a9   :  { %4989 = vmatprep.subr.bf16.mxu0 %v5390_v39 }
0x17ab   :  { %4456 = vmatmul.mubr.msk.f32.vlgmr.msra.gmra.mrb[30].mxu0 %vm271_vm8, %v1736_v24 }
0x17ac   :  { %4474 = vmatprep.mubr.msk.f32.mxu0 %vm5392_vm9, %v5393_v59 }
0x1876   :  { %v1936_v1 = vpop.f32.mrb[28].mxu0 }
0x1877   :  { %v1937_v2 = vadd.f32 %v5847_v61, %v1936_v1  ;;  %v4411_v3 = vpop.f32.mrb[29].mxu0 }
0x1878   :  { %v2343_v3 = vld [vmem:[%s6487_s11 + $0x8] sm:$0xff] }
0x1879   :  { %4445 = vmatmul.mubr.f32.vlgmr.msra.gmra.mrb[16].mxu1 %v1937_v2  ;;  %v2342_v2 = vld [vmem:[%s6487_s11] sm:$0xff] }
0x187a   :  { %4520 = vmatprep.mubr.msk.f32.mxu1 %vm5392_vm9, %v5393_v59 }
0x187e   :  { %v2107_v10 = vpop.f32.mrb[30].mxu0 }
0x187f   :  { %v2111_v4 = vadd.f32 %v2107_v10, %v5647_v19  ;;  %v4457_v8 = vpop.f32.mrb[31].mxu0  ;;  %v2344_v10 = vld [vmem:[%s6487_s11 + $0x10] sm:$0xff] }
0x1880   :  { %v2345_v8 = vld [vmem:[%s6487_s11 + $0x18] sm:$0xff] }
0x1881   :  { %5252 = vtanh.f32 %v2111_v4  ;;  %v3724_v6 = vmul.f32 -1.442695, %v2111_v4  ;;  %v6179_v4 = vpack.c.bf16 %v2343_v3, %v2342_v2 }
0x1883   :  { %5254 = vpow2.f32 %v3724_v6  ;;  %5009 = vmatpush3.bf16.msra.mxu1 %v6179_v4 }
0x1884   :  { %5010 = vmatprep.subr.bf16.mxu1 %v5390_v39 }
0x188b   :  { %v5253_v5 = vpop.eup %5252 }
0x188c   :  { %2121 = vrot.lane.b32.xlu0 %v5253_v5, %s5395_s4 }
0x188d   :  { %v5255_v47 = vpop.eup %5254 }
0x188e   :  { %v2115_v52 = vadd.f32 1.0, %v5255_v47  ;;  %v6187_v47 = vpack.c.bf16 %v2345_v8, %v2344_v10 }
0x1890   :  { %5256 = vrcp.f32 %v2115_v52  ;;  %v2346_v52 = vld [vmem:[%s6487_s11 + $0x20] sm:$0xff]  ;;  %5012 = vmatpush3.bf16.msra.mxu1 %v6187_v47 }
0x1891   :  { %5013 = vmatprep.subr.bf16.mxu1 %v5390_v39 }
0x189a   :  { %v5257_v38 = vpop.eup %5256 }
0x189b   :  { %v2119_v19 = vmul.f32 %v5257_v38, %v6022_v15  ;;  %v2151_v15 = vld [vmem:[%s6481_s5 + $0x38] sm:$0xff] }
0x189c   :  { %v6125_v14 = vpack.c.bf16 %v2151_v15, %v2150_v9  ;;  %v2356_v15 = vld [vmem:[%s6487_s11 + $0x70] sm:$0xff] }
0x18fe   :  { %v2122_v61 = vpop.permute.xlu0 %2121 }
0x18ff   :  { %v2124_v41 = vmul.f32 %v5257_v38, %v2122_v61 }
0x1901   :  { %2126 = vrot.lane.b32.xlu1 %v2124_v41, %s5394_s24  ;;  %v2348_v41 = vld [vmem:[%s6487_s11 + $0x30] sm:$0xff] }
0x194c   :  { %v2029_v44 = vpop.f32.mrb[16].mxu1 }
0x194d   :  { %v2030_v49 = vadd.f32 %v5871_v12, %v2029_v44  ;;  %v4446_v27 = vpop.f32.mrb[17].mxu1  ;;  %v2145_v12 = vld [vmem:[%s6481_s5 + $0x8] sm:$0xff]  ;;  %v2349_v44 = vld [vmem:[%s6487_s11 + $0x38] sm:$0xff] }
0x194e   :  { %v6098_v45 = vpack.c.bf16 %v2145_v12, %v2144_v35  ;;  %v2350_v27 = vld [vmem:[%s6487_s11 + $0x40] sm:$0xff]  ;;  %v2352_v35 = vld [vmem:[%s6487_s11 + $0x50] sm:$0xff]  ;;  %v2353_v12 = vld [vmem:[%s6487_s11 + $0x58] sm:$0xff] }
0x194f   :  { %2033 = vst [vmem:[%s6489_s13 + $0x18] sm:$0xff] %v2030_v49  ;;  %v6209_v49 = vpack.c.bf16 %v2349_v44, %v2348_v41  ;;  %v6229_v40 = vpack.c.bf16 %v2353_v12, %v2352_v35 }
0x1950   :  { %4991 = vmatpush3.bf16.msra.mxu0 %v6098_v45 }
0x1951   :  { %4992 = vmatprep.subr.bf16.mxu0 %v5390_v39 }
0x1954   :  { %4994 = vmatpush3.bf16.msra.mxu0 %v6104_v50 }
0x1955   :  { %4995 = vmatprep.subr.bf16.mxu0 %v5390_v39 }
0x1958   :  { %4997 = vmatpush3.bf16.msra.mxu0 %v6114_v60 }
0x1959   :  { %4998 = vmatprep.subr.bf16.mxu0 %v5390_v39 }
0x195c   :  { %5000 = vmatpush3.bf16.msra.mxu0 %v6125_v14 }
0x195d   :  { %5001 = vmatprep.subr.bf16.mxu0 %v5390_v39 }
0x1973   :  { %v2127_v13 = vpop.permute.xlu1 %2126 }
0x1974   :  { %v6086_v31 = vadd.f32 %v2127_v13, %v2119_v19  ;;  %v2351_v19 = vld [vmem:[%s6487_s11 + $0x48] sm:$0xff] }
0x1975   :  { %v6219_v13 = vpack.c.bf16 %v2351_v19, %v2350_v27 }
0x1976   :  { %5258 = vtanh.f32 %v6086_v31 }
0x1980   :  { %v5259_v11 = vpop.eup %5258 }
0x1981   :  { %2132 = vrot.lane.b32.xlu0 %v5259_v11, %s5395_s4  ;;  %v2357_v11 = vld [vmem:[%s6487_s11 + $0x78] sm:$0xff] }
0x1985   :  { %2140 = vrot.lane.b32.xlu0 %v6045_v48, %s5395_s4 }
0x19f3   :  { %v2133_v18 = vpop.permute.xlu0 %2132 }
0x19f4   :  { %v2135_v22 = vmul.f32 %v5257_v38, %v2133_v18  ;;  %v2347_v38 = vld [vmem:[%s6487_s11 + $0x28] sm:$0xff]  ;;  %v6269_v18 = vpack.c.bf16 %v2357_v11, %v2356_v15 }
0x19f5   :  { %v6199_v61 = vpack.c.bf16 %v2347_v38, %v2346_v52 }
0x19f6   :  { %2137 = vrot.lane.b32.xlu1 %v2135_v22, %s5394_s24  ;;  %v6273_v22 = vld [vmem:[#allocation5] ss:$0 sm:$0xff] }
0x19f7   :  { %v2141_v24 = vpop.permute.xlu0 %2140  ;;  %5015 = vmatpush3.bf16.msra.mxu1 %v6199_v61 }
0x19f8   :  { %5016 = vmatprep.subr.bf16.mxu1 %v5390_v39 }
0x19fb   :  { %5018 = vmatpush3.bf16.msra.mxu1 %v6209_v49 }
0x19fc   :  { %5019 = vmatprep.subr.bf16.mxu1 %v5390_v39 }
0x19ff   :  { %5021 = vmatpush3.bf16.msra.mxu1 %v6219_v13 }
0x1a00   :  { %5022 = vmatprep.subr.bf16.mxu1 %v5390_v39 }
0x1a03   :  { %5024 = vmatpush3.bf16.msra.mxu1 %v6229_v40 }
0x1a04   :  { %5025 = vmatprep.subr.bf16.mxu1 %v5390_v39 }
0x1a07   :  { %5027 = vmatpush3.bf16.msra.mxu1 %v6239_v54 }
0x1a08   :  { %5028 = vmatprep.subr.bf16.mxu1 %v5390_v39 }
0x1a0b   :  { %5030 = vmatpush3.bf16.msra.mxu1 %v6269_v18 }
0x1a0c   :  { %5055 = vmatprep.subr.bf16.mxu1 %v5390_v39 }
0x1a68   :  { %v6133_v25 = vpop.permute.xlu1 %2137 }
0x1a69   :  { %v2143_v28 = vsel %vm271_vm8, %v6133_v25, %v2141_v24 }
0x1a6a   :  { %4475 = vmatmul.mubr.msk.f32.vlgmr.msra.gmra.mrb[32].mxu0 %vm546_vm10, %v2143_v28 }
0x1a6b   :  { %4485 = vmatprep.mubr.msk.f32.mxu0 %vm5392_vm9, %v5393_v59  ;;  %5003 = vmatpush3.bf16.msra.mxu0 %v6158_v57 }
0x1a6c   :  { %5004 = vmatprep.subr.bf16.mxu0 %v5390_v39 }
0x1b3d   :  { %v2228_v32 = vpop.f32.mrb[32].mxu0 }
0x1b3e   :  { %v2229_v33 = vadd.f32 %v6140_v29, %v2228_v32  ;;  %v4476_v36 = vpop.f32.mrb[33].mxu0 }
0x1b40   :  { %5260 = vtanh.f32 %v2229_v33  ;;  %v3727_v37 = vmul.f32 -1.442695, %v2229_v33 }
0x1b42   :  { %5262 = vpow2.f32 %v3727_v37 }
0x1b4a   :  { %v5261_v16 = vpop.eup %5260 }
0x1b4b   :  { %2241 = vrot.lane.b32.xlu1 %v5261_v16, %s5395_s4 }
0x1b4c   :  { %v5263_v34 = vpop.eup %5262 }
0x1b4d   :  { %v2235_v30 = vadd.f32 1.0, %v5263_v34 }
0x1b4f   :  { %5264 = vrcp.f32 %v2235_v30 }
0x1b59   :  { %v5265_v42 = vpop.eup %5264 }
0x1b5a   :  { %v2239_v58 = vmul.f32 %v5265_v42, %v6041_v46  ;;  %v2259_v46 = vld [vmem:[%s6485_s9 + $0x18] sm:$0xff] }
0x1b5b   :  { %v6164_v62 = vpack.c.bf16 %v2259_v46, %v2258_v56 }
0x1b5d   :  { %5006 = vmatpush3.bf16.msra.mxu0 %v6164_v62 }
0x1b5e   :  { %5031 = vmatprep.subr.bf16.mxu0 %v5390_v39 }
0x1bbd   :  { %v2242_v20 = vpop.permute.xlu1 %2241 }
0x1bbe   :  { %v2244_v43 = vmul.f32 %v5265_v42, %v2242_v20 }
0x1bc0   :  { %2246 = vrot.lane.b32.xlu0 %v2244_v43, %s5394_s24  ;;  %v6297_v43 = vld [vmem:[#allocation7] ss:$0 sm:$0xff] }
0x1c32   :  { %v2247_v26 = vpop.permute.xlu0 %2246 }
0x1c33   :  { %v6146_v48 = vadd.f32 %v2247_v26, %v2239_v58 }
0x1c35   :  { %5266 = vtanh.f32 %v6146_v48 }
0x1c3f   :  { %v5267_v1 = vpop.eup %5266 }
0x1c40   :  { %2252 = vrot.lane.b32.xlu1 %v5267_v1, %s5395_s4 }
0x1cb2   :  { %v2253_v5 = vpop.permute.xlu1 %2252 }
0x1cb3   :  { %v6184_v6 = vmul.f32 %v5265_v42, %v2253_v5 }
0x1cb5   :  { %2268 = vrot.lane.b32.xlu0 %v6184_v6, %s5394_s24 }
0x1d27   :  { %v2269_v9 = vpop.permute.xlu0 %2268 }
0x1d28   :  { %4486 = vmatmul.mubr.msk.f32.vlgmr.msra.gmra.mrb[34].mxu0 %vm271_vm8, %v2269_v9 }
0x1d29   :  { %5033 = vmatpush3.bf16.msra.mxu0 %v6055_v55  ;;  %4531 = vmatprep.mubr.msk.f32.mxu0 %vm5392_vm9, %v5393_v59 }
0x1d2a   :  { %5034 = vmatprep.subr.bf16.mxu0 %v5390_v39 }
0x1d2d   :  { %5036 = vmatpush3.bf16.msra.mxu0 %v6065_v0 }
0x1d2e   :  { %5037 = vmatprep.subr.bf16.mxu0 %v5390_v39 }
0x1d30   :  { %4532 = vmatmul.mubr.msk.f32.vlgmr.msra.gmra.mrb[36].mxu0 %vm271_vm8, %v6133_v25 }
0x1d31   :  { %5039 = vmatpush3.bf16.msra.mxu0 %v6098_v45  ;;  %4550 = vmatprep.mubr.msk.f32.mxu0 %vm5392_vm9, %v5393_v59 }
0x1d32   :  { %5040 = vmatprep.subr.bf16.mxu0 %v5390_v39 }
0x1d35   :  { %5042 = vmatpush3.bf16.msra.mxu0 %v6104_v50 }
0x1d36   :  { %5043 = vmatprep.subr.bf16.mxu0 %v5390_v39 }
0x1d39   :  { %5045 = vmatpush3.bf16.msra.mxu0 %v6114_v60 }
0x1d3a   :  { %5046 = vmatprep.subr.bf16.mxu0 %v5390_v39 }
0x1d3d   :  { %5048 = vmatpush3.bf16.msra.mxu0 %v6125_v14 }
0x1d3e   :  { %5049 = vmatprep.subr.bf16.mxu0 %v5390_v39 }
0x1dfb   :  { %v2338_v24 = vpop.f32.mrb[34].mxu0 }
0x1dfc   :  { %v2339_v25 = vadd.f32 %v6273_v22, %v2338_v24  ;;  %v4487_v28 = vpop.f32.mrb[35].mxu0 }
0x1dfe   :  { %4521 = vmatmul.mubr.f32.vlgmr.msra.gmra.mrb[18].mxu1 %v2339_v25 }
0x1dff   :  { %5057 = vmatpush3.bf16.msra.mxu1 %v6179_v4  ;;  %4596 = vmatprep.mubr.msk.f32.mxu1 %vm5392_vm9, %v5393_v59 }
0x1e00   :  { %5058 = vmatprep.subr.bf16.mxu1 %v5390_v39 }
0x1e03   :  { %v2509_v32 = vpop.f32.mrb[36].mxu0  ;;  %5060 = vmatpush3.bf16.msra.mxu1 %v6187_v47 }
0x1e04   :  { %v2513_v33 = vadd.f32 %v2509_v32, %v5645_v17  ;;  %v4533_v36 = vpop.f32.mrb[37].mxu0  ;;  %5061 = vmatprep.subr.bf16.mxu1 %v5390_v39 }
0x1e06   :  { %5268 = vtanh.f32 %v2513_v33  ;;  %v3732_v17 = vmul.f32 -1.442695, %v2513_v33 }
0x1e07   :  { %5063 = vmatpush3.bf16.msra.mxu1 %v6199_v61 }
0x1e08   :  { %5064 = vmatprep.subr.bf16.mxu1 %v5390_v39  ;;  %5270 = vpow2.f32 %v3732_v17 }
0x1e0b   :  { %5066 = vmatpush3.bf16.msra.mxu1 %v6209_v49 }
0x1e0c   :  { %5067 = vmatprep.subr.bf16.mxu1 %v5390_v39 }
0x1e0f   :  { %5069 = vmatpush3.bf16.msra.mxu1 %v6219_v13 }
0x1e10   :  { %v5269_v16 = vpop.eup %5268  ;;  %5070 = vmatprep.subr.bf16.mxu1 %v5390_v39 }
0x1e11   :  { %2523 = vrot.lane.b32.xlu1 %v5269_v16, %s5395_s4 }
0x1e12   :  { %v5271_v37 = vpop.eup %5270 }
0x1e13   :  { %5072 = vmatpush3.bf16.msra.mxu1 %v6229_v40  ;;  %v2517_v34 = vadd.f32 1.0, %v5271_v37 }
0x1e14   :  { %5073 = vmatprep.subr.bf16.mxu1 %v5390_v39 }
0x1e15   :  { %5272 = vrcp.f32 %v2517_v34 }
0x1e17   :  { %5075 = vmatpush3.bf16.msra.mxu1 %v6239_v54 }
0x1e18   :  { %5076 = vmatprep.subr.bf16.mxu1 %v5390_v39 }
0x1e1b   :  { %5078 = vmatpush3.bf16.msra.mxu1 %v6269_v18 }
0x1e1c   :  { %5103 = vmatprep.subr.bf16.mxu1 %v5390_v39 }
0x1e1f   :  { %v5273_v30 = vpop.eup %5272 }
0x1e20   :  { %v2521_v53 = vmul.f32 %v5273_v30, %v6086_v31 }
0x1e83   :  { %v2524_v42 = vpop.permute.xlu1 %2523 }
0x1e84   :  { %v2526_v20 = vmul.f32 %v5273_v30, %v2524_v42 }
0x1e86   :  { %2528 = vrot.lane.b32.xlu0 %v2526_v20, %s5394_s24 }
0x1ed1   :  { %v2431_v58 = vpop.f32.mrb[18].mxu1 }
0x1ed2   :  { %v2432_v26 = vadd.f32 %v6297_v43, %v2431_v58  ;;  %v4522_v51 = vpop.f32.mrb[19].mxu1 }
0x1ed4   :  { %2435 = vst [vmem:[%s6489_s13 + $0x20] sm:$0xff] %v2432_v26 }
0x1ef8   :  { %v2529_v56 = vpop.permute.xlu0 %2528 }
0x1ef9   :  { %v6304_v46 = vadd.f32 %v2529_v56, %v2521_v53 }
0x1efb   :  { %5274 = vtanh.f32 %v6304_v46 }
0x1f05   :  { %v5275_v1 = vpop.eup %5274 }
0x1f06   :  { %2534 = vrot.lane.b32.xlu1 %v5275_v1, %s5395_s4 }
0x1f0a   :  { %2542 = vrot.lane.b32.xlu1 %v6184_v6, %s5395_s4 }
0x1f78   :  { %v2535_v2 = vpop.permute.xlu1 %2534 }
0x1f79   :  { %v2537_v3 = vmul.f32 %v5273_v30, %v2535_v2 }
0x1f7b   :  { %2539 = vrot.lane.b32.xlu0 %v2537_v3, %s5394_s24 }
0x1f7c   :  { %v2543_v10 = vpop.permute.xlu1 %2542 }
0x1fed   :  { %v2540_v8 = vpop.permute.xlu0 %2539 }
0x1fee   :  { %v2545_v5 = vsel %vm271_vm8, %v2540_v8, %v2543_v10 }
0x1fef   :  { %4551 = vmatmul.mubr.msk.f32.vlgmr.msra.gmra.mrb[38].mxu0 %vm546_vm10, %v2545_v5 }
0x1ff0   :  { %5051 = vmatpush3.bf16.msra.mxu0 %v6158_v57  ;;  %4561 = vmatprep.mubr.msk.f32.mxu0 %vm5392_vm9, %v5393_v59 }
0x1ff1   :  { %5052 = vmatprep.subr.bf16.mxu0 %v5390_v39 }
0x1ff4   :  { %5054 = vmatpush3.bf16.msra.mxu0 %v6164_v62 }
0x1ff5   :  { %5079 = vmatprep.subr.bf16.mxu0 %v5390_v39 }
0x20c2   :  { %v2630_v31 = vpop.f32.mrb[38].mxu0 }
0x20c3   :  { %v2631_v6 = vadd.f32 %v6140_v29, %v2630_v31  ;;  %v4552_v52 = vpop.f32.mrb[39].mxu0 }
0x20c5   :  { %5276 = vtanh.f32 %v2631_v6  ;;  %v3735_v41 = vmul.f32 -1.442695, %v2631_v6 }
0x20c7   :  { %5278 = vpow2.f32 %v3735_v41 }
0x20cf   :  { %v5277_v38 = vpop.eup %5276 }
0x20d0   :  { %2643 = vrot.lane.b32.xlu0 %v5277_v38, %s5395_s4 }
0x20d1   :  { %v5279_v44 = vpop.eup %5278 }
0x20d2   :  { %v2637_v27 = vadd.f32 1.0, %v5279_v44 }
0x20d4   :  { %5280 = vrcp.f32 %v2637_v27 }
0x20de   :  { %v5281_v19 = vpop.eup %5280 }
0x20df   :  { %v2641_v63 = vmul.f32 %v5281_v19, %v6146_v48 }
0x2142   :  { %v2644_v35 = vpop.permute.xlu0 %2643 }
0x2143   :  { %v2646_v12 = vmul.f32 %v5281_v19, %v2644_v35 }
0x2145   :  { %2648 = vrot.lane.b32.xlu1 %v2646_v12, %s5394_s24 }
0x21b7   :  { %v2649_v7 = vpop.permute.xlu1 %2648 }
0x21b8   :  { %v6323_v9 = vadd.f32 %v2649_v7, %v2641_v63 }
0x21ba   :  { %5282 = vtanh.f32 %v6323_v9 }
0x21c4   :  { %v5283_v15 = vpop.eup %5282 }
0x21c5   :  { %2654 = vrot.lane.b32.xlu0 %v5283_v15, %s5395_s4 }
0x2237   :  { %v2655_v11 = vpop.permute.xlu0 %2654 }
0x2238   :  { %v6327_v24 = vmul.f32 %v5281_v19, %v2655_v11 }
0x223a   :  { %2670 = vrot.lane.b32.xlu1 %v6327_v24, %s5394_s24 }
0x22ac   :  { %v2671_v25 = vpop.permute.xlu1 %2670 }
0x22ad   :  { %4562 = vmatmul.mubr.msk.f32.vlgmr.msra.gmra.mrb[40].mxu0 %vm271_vm8, %v2671_v25 }
0x22ae   :  { %5081 = vmatpush3.bf16.msra.mxu0 %v6055_v55  ;;  %4607 = vmatprep.mubr.msk.f32.mxu0 %vm5392_vm9, %v5393_v59 }
0x22af   :  { %5082 = vmatprep.subr.bf16.mxu0 %v5390_v39 }
0x22b2   :  { %5084 = vmatpush3.bf16.msra.mxu0 %v6065_v0 }
0x22b3   :  { %5085 = vmatprep.subr.bf16.mxu0 %v5390_v39 }
0x22b5   :  { %4608 = vmatmul.mubr.msk.f32.vlgmr.msra.gmra.mrb[42].mxu0 %vm271_vm8, %v2540_v8 }
0x22b6   :  { %5087 = vmatpush3.bf16.msra.mxu0 %v6098_v45  ;;  %4626 = vmatprep.mubr.msk.f32.mxu0 %vm5392_vm9, %v5393_v59 }
0x22b7   :  { %5088 = vmatprep.subr.bf16.mxu0 %v5390_v39 }
0x22ba   :  { %5090 = vmatpush3.bf16.msra.mxu0 %v6104_v50 }
0x22bb   :  { %5091 = vmatprep.subr.bf16.mxu0 %v5390_v39 }
0x22be   :  { %5093 = vmatpush3.bf16.msra.mxu0 %v6114_v60 }
0x22bf   :  { %5094 = vmatprep.subr.bf16.mxu0 %v5390_v39 }
0x22c2   :  { %5096 = vmatpush3.bf16.msra.mxu0 %v6125_v14 }
0x22c3   :  { %5097 = vmatprep.subr.bf16.mxu0 %v5390_v39 }
0x2380   :  { %v2740_v48 = vpop.f32.mrb[40].mxu0 }
0x2381   :  { %v2741_v28 = vadd.f32 %v6273_v22, %v2740_v48  ;;  %v4563_v32 = vpop.f32.mrb[41].mxu0 }
0x2383   :  { %4597 = vmatmul.mubr.f32.vlgmr.msra.gmra.mrb[20].mxu1 %v2741_v28 }
0x2384   :  { %5105 = vmatpush3.bf16.msra.mxu1 %v6179_v4  ;;  %4672 = vmatprep.mubr.msk.f32.mxu1 %vm5392_vm9, %v5393_v59 }
0x2385   :  { %5106 = vmatprep.subr.bf16.mxu1 %v5390_v39 }
0x2388   :  { %v2911_v33 = vpop.f32.mrb[42].mxu0  ;;  %5108 = vmatpush3.bf16.msra.mxu1 %v6187_v47 }
0x2389   :  { %v2915_v36 = vadd.f32 %v2911_v33, %v5651_v23  ;;  %v4609_v16 = vpop.f32.mrb[43].mxu0  ;;  %5109 = vmatprep.subr.bf16.mxu1 %v5390_v39 }
0x238b   :  { %5284 = vtanh.f32 %v2915_v36  ;;  %v3740_v23 = vmul.f32 -1.442695, %v2915_v36 }
0x238c   :  { %5111 = vmatpush3.bf16.msra.mxu1 %v6199_v61 }
0x238d   :  { %5112 = vmatprep.subr.bf16.mxu1 %v5390_v39  ;;  %5286 = vpow2.f32 %v3740_v23 }
0x2390   :  { %5114 = vmatpush3.bf16.msra.mxu1 %v6209_v49 }
0x2391   :  { %5115 = vmatprep.subr.bf16.mxu1 %v5390_v39 }
0x2394   :  { %5117 = vmatpush3.bf16.msra.mxu1 %v6219_v13 }
0x2395   :  { %v5285_v17 = vpop.eup %5284  ;;  %5118 = vmatprep.subr.bf16.mxu1 %v5390_v39 }
0x2396   :  { %2925 = vrot.lane.b32.xlu0 %v5285_v17, %s5395_s4 }
0x2397   :  { %v5287_v37 = vpop.eup %5286 }
0x2398   :  { %5120 = vmatpush3.bf16.msra.mxu1 %v6229_v40  ;;  %v2919_v34 = vadd.f32 1.0, %v5287_v37 }
0x2399   :  { %5121 = vmatprep.subr.bf16.mxu1 %v5390_v39 }
0x239a   :  { %5288 = vrcp.f32 %v2919_v34 }
0x239c   :  { %5123 = vmatpush3.bf16.msra.mxu1 %v6239_v54 }
0x239d   :  { %5124 = vmatprep.subr.bf16.mxu1 %v5390_v39 }
0x23a0   :  { %5126 = vmatpush3.bf16.msra.mxu1 %v6269_v18 }
0x23a1   :  { %5151 = vmatprep.subr.bf16.mxu1 %v5390_v39 }
0x23a4   :  { %v5289_v30 = vpop.eup %5288 }
0x23a5   :  { %v2923_v53 = vmul.f32 %v5289_v30, %v6304_v46 }
0x2408   :  { %v2926_v42 = vpop.permute.xlu0 %2925 }
0x2409   :  { %v2928_v20 = vmul.f32 %v5289_v30, %v2926_v42 }
0x240b   :  { %2930 = vrot.lane.b32.xlu1 %v2928_v20, %s5394_s24 }
0x2456   :  { %v2833_v58 = vpop.f32.mrb[20].mxu1 }
0x2457   :  { %v2834_v26 = vadd.f32 %v6297_v43, %v2833_v58  ;;  %v4598_v51 = vpop.f32.mrb[21].mxu1 }
0x2459   :  { %2837 = vst [vmem:[%s6489_s13 + $0x28] sm:$0xff] %v2834_v26 }
0x247d   :  { %v2931_v56 = vpop.permute.xlu1 %2930 }
0x247e   :  { %v6376_v1 = vadd.f32 %v2931_v56, %v2923_v53 }
0x2480   :  { %5290 = vtanh.f32 %v6376_v1 }
0x248a   :  { %v5291_v2 = vpop.eup %5290 }
0x248b   :  { %2936 = vrot.lane.b32.xlu0 %v5291_v2, %s5395_s4 }
0x248f   :  { %2944 = vrot.lane.b32.xlu0 %v6327_v24, %s5395_s4 }
0x24fd   :  { %v2937_v3 = vpop.permute.xlu0 %2936 }
0x24fe   :  { %v2939_v10 = vmul.f32 %v5289_v30, %v2937_v3 }
0x2500   :  { %2941 = vrot.lane.b32.xlu1 %v2939_v10, %s5394_s24 }
0x2501   :  { %v2945_v8 = vpop.permute.xlu0 %2944 }
0x2572   :  { %v2942_v5 = vpop.permute.xlu1 %2941 }
0x2573   :  { %v2947_v31 = vsel %vm271_vm8, %v2942_v5, %v2945_v8 }
0x2574   :  { %4627 = vmatmul.mubr.msk.f32.vlgmr.msra.gmra.mrb[44].mxu0 %vm546_vm10, %v2947_v31 }
0x2575   :  { %5099 = vmatpush3.bf16.msra.mxu0 %v6158_v57  ;;  %4637 = vmatprep.mubr.msk.f32.mxu0 %vm5392_vm9, %v5393_v59 }
0x2576   :  { %5100 = vmatprep.subr.bf16.mxu0 %v5390_v39 }
0x2579   :  { %5102 = vmatpush3.bf16.msra.mxu0 %v6164_v62 }
0x257a   :  { %5127 = vmatprep.subr.bf16.mxu0 %v5390_v39 }
0x2647   :  { %v3032_v46 = vpop.f32.mrb[44].mxu0 }
0x2648   :  { %v3033_v6 = vadd.f32 %v6140_v29, %v3032_v46  ;;  %v4628_v52 = vpop.f32.mrb[45].mxu0 }
0x264a   :  { %5292 = vtanh.f32 %v3033_v6  ;;  %v3743_v41 = vmul.f32 -1.442695, %v3033_v6 }
0x264c   :  { %5294 = vpow2.f32 %v3743_v41 }
0x2654   :  { %v5293_v38 = vpop.eup %5292 }
0x2655   :  { %3045 = vrot.lane.b32.xlu1 %v5293_v38, %s5395_s4 }
0x2656   :  { %v5295_v44 = vpop.eup %5294 }
0x2657   :  { %v3039_v27 = vadd.f32 1.0, %v5295_v44 }
0x2659   :  { %5296 = vrcp.f32 %v3039_v27 }
0x2663   :  { %v5297_v19 = vpop.eup %5296 }
0x2664   :  { %v3043_v63 = vmul.f32 %v5297_v19, %v6323_v9 }
0x26c7   :  { %v3046_v35 = vpop.permute.xlu1 %3045 }
0x26c8   :  { %v3048_v12 = vmul.f32 %v5297_v19, %v3046_v35 }
0x26ca   :  { %3050 = vrot.lane.b32.xlu0 %v3048_v12, %s5394_s24 }
0x273c   :  { %v3051_v7 = vpop.permute.xlu0 %3050 }
0x273d   :  { %v6395_v15 = vadd.f32 %v3051_v7, %v3043_v63 }
0x273f   :  { %5298 = vtanh.f32 %v6395_v15 }
0x2749   :  { %v5299_v11 = vpop.eup %5298 }
0x274a   :  { %3056 = vrot.lane.b32.xlu1 %v5299_v11, %s5395_s4 }
0x27bc   :  { %v3057_v24 = vpop.permute.xlu1 %3056 }
0x27bd   :  { %v6399_v25 = vmul.f32 %v5297_v19, %v3057_v24 }
0x27bf   :  { %3072 = vrot.lane.b32.xlu0 %v6399_v25, %s5394_s24 }
0x2831   :  { %v3073_v48 = vpop.permute.xlu0 %3072 }
0x2832   :  { %4638 = vmatmul.mubr.msk.f32.vlgmr.msra.gmra.mrb[46].mxu0 %vm271_vm8, %v3073_v48 }
0x2833   :  { %5129 = vmatpush3.bf16.msra.mxu0 %v6055_v55  ;;  %4683 = vmatprep.mubr.msk.f32.mxu0 %vm5392_vm9, %v5393_v59 }
0x2834   :  { %5130 = vmatprep.subr.bf16.mxu0 %v5390_v39 }
0x2837   :  { %5132 = vmatpush3.bf16.msra.mxu0 %v6065_v0 }
0x2838   :  { %5133 = vmatprep.subr.bf16.mxu0 %v5390_v39 }
0x283a   :  { %4684 = vmatmul.mubr.msk.f32.vlgmr.msra.gmra.mrb[48].mxu0 %vm271_vm8, %v2942_v5 }
0x283b   :  { %5135 = vmatpush3.bf16.msra.mxu0 %v6098_v45  ;;  %4702 = vmatprep.mubr.msk.f32.mxu0 %vm5392_vm9, %v5393_v59 }
0x283c   :  { %5136 = vmatprep.subr.bf16.mxu0 %v5390_v39 }
0x283f   :  { %5138 = vmatpush3.bf16.msra.mxu0 %v6104_v50 }
0x2840   :  { %5139 = vmatprep.subr.bf16.mxu0 %v5390_v39 }
0x2843   :  { %5141 = vmatpush3.bf16.msra.mxu0 %v6114_v60 }
0x2844   :  { %5142 = vmatprep.subr.bf16.mxu0 %v5390_v39 }
0x2847   :  { %5144 = vmatpush3.bf16.msra.mxu0 %v6125_v14 }
0x2848   :  { %5145 = vmatprep.subr.bf16.mxu0 %v5390_v39 }
0x2905   :  { %v3142_v55 = vpop.f32.mrb[46].mxu0 }
0x2906   :  { %v3143_v0 = vadd.f32 %v6273_v22, %v3142_v55  ;;  %v4639_v45 = vpop.f32.mrb[47].mxu0 }
0x2908   :  { %4673 = vmatmul.mubr.f32.vlgmr.msra.gmra.mrb[22].mxu1 %v3143_v0 }
0x2909   :  { %5153 = vmatpush3.bf16.msra.mxu1 %v6179_v4  ;;  %4748 = vmatprep.mubr.msk.f32.mxu1 %vm5392_vm9, %v5393_v59 }
0x290a   :  { %5154 = vmatprep.subr.bf16.mxu1 %v5390_v39 }
0x290d   :  { %v3313_v50 = vpop.f32.mrb[48].mxu0  ;;  %5156 = vmatpush3.bf16.msra.mxu1 %v6187_v47 }
0x290e   :  { %v3317_v60 = vadd.f32 %v3313_v50, %v5649_v21  ;;  %v4685_v14 = vpop.f32.mrb[49].mxu0  ;;  %5157 = vmatprep.subr.bf16.mxu1 %v5390_v39 }
0x2910   :  { %5300 = vtanh.f32 %v3317_v60  ;;  %v3748_v21 = vmul.f32 -1.442695, %v3317_v60 }
0x2911   :  { %5159 = vmatpush3.bf16.msra.mxu1 %v6199_v61 }
0x2912   :  { %5160 = vmatprep.subr.bf16.mxu1 %v5390_v39  ;;  %5302 = vpow2.f32 %v3748_v21 }
0x2915   :  { %5162 = vmatpush3.bf16.msra.mxu1 %v6209_v49 }
0x2916   :  { %5163 = vmatprep.subr.bf16.mxu1 %v5390_v39 }
0x2919   :  { %5165 = vmatpush3.bf16.msra.mxu1 %v6219_v13 }
0x291a   :  { %v5301_v4 = vpop.eup %5300  ;;  %5166 = vmatprep.subr.bf16.mxu1 %v5390_v39 }
0x291b   :  { %3327 = vrot.lane.b32.xlu1 %v5301_v4, %s5395_s4 }
0x291c   :  { %v5303_v47 = vpop.eup %5302 }
0x291d   :  { %5168 = vmatpush3.bf16.msra.mxu1 %v6229_v40  ;;  %v3321_v61 = vadd.f32 1.0, %v5303_v47 }
0x291e   :  { %5169 = vmatprep.subr.bf16.mxu1 %v5390_v39 }
0x291f   :  { %5304 = vrcp.f32 %v3321_v61 }
0x2921   :  { %5171 = vmatpush3.bf16.msra.mxu1 %v6239_v54 }
0x2922   :  { %5172 = vmatprep.subr.bf16.mxu1 %v5390_v39 }
0x2925   :  { %5174 = vmatpush3.bf16.msra.mxu1 %v6269_v18 }
0x2929   :  { %v5305_v49 = vpop.eup %5304 }
0x292a   :  { %v3325_v54 = vmul.f32 %v5305_v49, %v6376_v1 }
0x298d   :  { %v3328_v13 = vpop.permute.xlu1 %3327 }
0x298e   :  { %v3330_v9 = vmul.f32 %v5305_v49, %v3328_v13 }
0x2990   :  { %3332 = vrot.lane.b32.xlu0 %v3330_v9, %s5394_s24 }
0x29db   :  { %v3235_v28 = vpop.f32.mrb[22].mxu1 }
0x29dc   :  { %v3236_v40 = vadd.f32 %v6297_v43, %v3235_v28  ;;  %v4674_v32 = vpop.f32.mrb[23].mxu1 }
0x29de   :  { %3239 = vst [vmem:[%s6489_s13 + $0x30] sm:$0xff] %v3236_v40 }
0x2a02   :  { %v3333_v18 = vpop.permute.xlu0 %3332 }
0x2a03   :  { %v3335_v33 = vadd.f32 %v3333_v18, %v3325_v54 }
0x2a05   :  { %5306 = vtanh.f32 %v3335_v33 }
0x2a0f   :  { %v5307_v36 = vpop.eup %5306 }
0x2a10   :  { %3338 = vrot.lane.b32.xlu1 %v5307_v36, %s5395_s4 }
0x2a14   :  { %3346 = vrot.lane.b32.xlu1 %v6399_v25, %s5395_s4 }
0x2a82   :  { %v3339_v16 = vpop.permute.xlu1 %3338 }
0x2a83   :  { %v3341_v17 = vmul.f32 %v5305_v49, %v3339_v16 }
0x2a85   :  { %3343 = vrot.lane.b32.xlu0 %v3341_v17, %s5394_s24 }
0x2a86   :  { %v3347_v23 = vpop.permute.xlu1 %3346 }
0x2af7   :  { %v3344_v37 = vpop.permute.xlu0 %3343 }
0x2af8   :  { %v3349_v34 = vsel %vm271_vm8, %v3344_v37, %v3347_v23  ;;  %v3649_v5 = vsel %vm271_vm8, %v3344_v37, %v3335_v33 }
0x2af9   :  { %4703 = vmatmul.mubr.msk.f32.vlgmr.msra.gmra.mrb[50].mxu0 %vm546_vm10, %v3349_v34 }
0x2afa   :  { %5147 = vmatpush3.bf16.msra.mxu0 %v6158_v57  ;;  %4713 = vmatprep.mubr.msk.f32.mxu0 %vm5392_vm9, %v5393_v59 }
0x2afb   :  { %5148 = vmatprep.subr.bf16.mxu0 %v5390_v39 }
0x2afe   :  { %5150 = vmatpush3.bf16.msra.mxu0 %v6164_v62 }
0x2bcc   :  { %v3434_v30 = vpop.f32.mrb[50].mxu0 }
0x2bcd   :  { %v3435_v42 = vadd.f32 %v6140_v29, %v3434_v30  ;;  %v4704_v20 = vpop.f32.mrb[51].mxu0 }
0x2bcf   :  { %5308 = vtanh.f32 %v3435_v42  ;;  %v3751_v26 = vmul.f32 -1.442695, %v3435_v42 }
0x2bd1   :  { %5310 = vpow2.f32 %v3751_v26 }
0x2bd9   :  { %v5309_v58 = vpop.eup %5308 }
0x2bda   :  { %3447 = vrot.lane.b32.xlu0 %v5309_v58, %s5395_s4 }
0x2bdb   :  { %v5311_v51 = vpop.eup %5310 }
0x2bdc   :  { %v3441_v53 = vadd.f32 1.0, %v5311_v51 }
0x2bde   :  { %5312 = vrcp.f32 %v3441_v53 }
0x2be8   :  { %v5313_v57 = vpop.eup %5312 }
0x2be9   :  { %v3445_v39 = vmul.f32 %v5313_v57, %v6395_v15 }
0x2c4c   :  { %v3448_v56 = vpop.permute.xlu0 %3447 }
0x2c4d   :  { %v3450_v59 = vmul.f32 %v5313_v57, %v3448_v56 }
0x2c4f   :  { %3452 = vrot.lane.b32.xlu1 %v3450_v59, %s5394_s24 }
0x2cc1   :  { %v3453_v62 = vpop.permute.xlu1 %3452 }
0x2cc2   :  { %v3455_v1 = vadd.f32 %v3453_v62, %v3445_v39 }
0x2cc4   :  { %5314 = vtanh.f32 %v3455_v1 }
0x2cce   :  { %v5315_v29 = vpop.eup %5314 }
0x2ccf   :  { %3458 = vrot.lane.b32.xlu0 %v5315_v29, %s5395_s4 }
0x2d41   :  { %v3459_v2 = vpop.permute.xlu0 %3458 }
0x2d42   :  { %v3461_v3 = vmul.f32 %v5313_v57, %v3459_v2 }
0x2d44   :  { %3642 = vrot.lane.b32.xlu0 %v3461_v3, %s5396_s30  ;;  %3474 = vrot.lane.b32.xlu1 %v3461_v3, %s5394_s24 }
0x2d48   :  { %3646 = vrot.lane.b32.xlu1 %v3455_v1, %s5395_s4 }
0x2db6   :  { %v3475_v10 = vpop.permute.xlu1 %3474  ;;  %v3643_v8 = vpop.permute.xlu0 %3642 }
0x2db7   :  { %4714 = vmatmul.mubr.msk.f32.vlgmr.msra.gmra.mrb[52].mxu0 %vm271_vm8, %v3475_v10  ;;  %v3650_v31 = vsel %vm546_vm10, %v3649_v5, %v3643_v8 }
0x2dba   :  { %v3647_v46 = vpop.permute.xlu1 %3646 }
0x2dbb   :  { %v3652_v6 = vsel %vm3651_vm11, %v3650_v31, %v3647_v46 }
0x2dbc   :  { %3653 = vst [vmem:[%s6490_s14] sm:$0xff] %v3652_v6 }
0x2e8a   :  { %v3544_v52 = vpop.f32.mrb[52].mxu0 }
0x2e8b   :  { %v3545_v38 = vadd.f32 %v6273_v22, %v3544_v52  ;;  %v4715_v41 = vpop.f32.mrb[53].mxu0 }
0x2e8d   :  { %4749 = vmatmul.mubr.f32.vlgmr.msra.gmra.mrb[24].mxu1 %v3545_v38 }
0x2f60   :  { %v3637_v44 = vpop.f32.mrb[24].mxu1 }
0x2f61   :  { %v3638_v27 = vadd.f32 %v6297_v43, %v3637_v44  ;;  %v4750_v19 = vpop.f32.mrb[25].mxu1 }
0x2f63   :  { %3641 = vst [vmem:[%s6489_s13 + $0x38] sm:$0xff] %v3638_v27 }
0x2f64   :  { %3662 = vsyncpa [#allocation4], 1 }
0x2f65   :  { %3663 = vsyncpa [#allocation6], 1 }

</bundles_post_ra>
